<compile_context>
chip_gen: v5e
topology: v5e:2x2
jax: 0.10.0
libtpu: 0.0.40
codegen_flags: <defaults>
</compile_context>

<pallas_src>
import functools

import numpy as np
import jax
import jax.numpy as jnp
from jax.experimental import pallas as pl
from jax.experimental.pallas import tpu as pltpu


TILE_E = 2048  # edges per grid step; multiple of 128 (lane-dense output row).
               # Per-etype edge counts are padded up to a multiple of TILE_E,
               # so size this against typical real per-etype edge counts.

ETYPES_ALL = [
    ('drug', 'contraindication', 'disease'),
    ('drug', 'indication', 'disease'),
    ('drug', 'off-label use', 'disease'),
    ('disease', 'rev_contraindication', 'drug'),
    ('disease', 'rev_indication', 'drug'),
    ('disease', 'rev_off-label use', 'drug'),
    ('gene/protein', 'protein_protein', 'gene/protein'),
    ('disease', 'disease_disease', 'disease'),
    ('drug', 'drug_protein', 'gene/protein'),
    ('gene/protein', 'disease_protein', 'disease'),
]


# ----------------------------------------------------------------------------
# Pallas kernel: fused DistMult edge scoring (all edge types, one launch)
# ----------------------------------------------------------------------------
def _distmult_fused_kernel(rel_ids_ref, hu_ref, hv_ref, w_ref, out_ref, *,
                           apply_sigmoid):
    """One tile of fused DistMult scoring (feature-major layout).

    rel_ids_ref : SMEM (num_tiles,) int32   tile -> relation row
    hu_ref      : VMEM (D, TILE_E)          gathered source embeddings
    hv_ref      : VMEM (D, TILE_E)          gathered destination embeddings
    w_ref       : VMEM (num_rels, D)        full relation table (VMEM-resident)
    out_ref     : VMEM (1, TILE_E)          lane-dense per-edge scores
    """
    rel = rel_ids_ref[pl.program_id(0)]                       # scalar from SMEM
    hr = w_ref[pl.ds(rel, 1), :].astype(jnp.float32)          # (1, D) dynamic row
    hu = hu_ref[...].astype(jnp.float32)                      # cast in-kernel (free on VPU)
    hv = hv_ref[...].astype(jnp.float32)
    prod = hu * hv                                            # (D, TILE_E) VPU elementwise
    # MXU-natural contraction: (1, D) @ (D, TILE_E) -> (1, TILE_E), lane-dense.
    score = jax.lax.dot_general(
        hr, prod,
        dimension_numbers=(((1,), (0,)), ((), ())),
        preferred_element_type=jnp.float32,
        precision=jax.lax.Precision.HIGHEST)
    if apply_sigmoid:
        score = jax.nn.sigmoid(score)                         # EUP
    out_ref[...] = score


def distmult_edge_scores_fused(hu_T, hv_T, w_rels, rel_per_tile, *,
                               apply_sigmoid, tile_e=TILE_E):
    """Fused DistMult scores for a padded, tile-aligned edge batch.

    hu_T, hv_T   : (D, E_pad) gathered embeddings (feature-major),
                   E_pad = num_tiles * tile_e; each group of tile_e consecutive
                   edges shares one relation.
    w_rels       : (num_rels, D) relation embedding table.
    rel_per_tile : (num_tiles,) int32 relation row index per tile.
    returns      : (E_pad,) f32 scores (padding rows hold garbage, sliced off
                   by the caller).
    """
    D, E_pad = hu_T.shape
    assert tile_e % 128 == 0 and E_pad % tile_e == 0
    num_tiles = E_pad // tile_e
    num_rels, Dw = w_rels.shape
    assert Dw == D

    # VMEM budget: 2 inputs x 2 buffers x (D, tile_e) + resident W + output,
    # sized with headroom but capped so it is valid on v7x (64 MiB physical).
    itemsize = jnp.dtype(hu_T.dtype).itemsize
    block_bytes = 2 * 2 * D * tile_e * itemsize + num_rels * D * 4 + 2 * tile_e * 4
    vmem_limit = int(min(max(2 * block_bytes, 16 * 2**20), 48 * 2**20))

    cost = pl.CostEstimate(
        flops=4 * E_pad * D,
        transcendentals=E_pad if apply_sigmoid else 0,
        bytes_accessed=2 * E_pad * D * itemsize + E_pad * 4 + num_rels * D * 4)

    kernel = functools.partial(_distmult_fused_kernel,
                               apply_sigmoid=apply_sigmoid)
    out = pl.pallas_call(
        kernel,
        out_shape=jax.ShapeDtypeStruct((1, E_pad), jnp.float32),
        grid_spec=pltpu.PrefetchScalarGridSpec(
            num_scalar_prefetch=1,
            grid=(num_tiles,),
            in_specs=[
                pl.BlockSpec((D, tile_e), lambda i, rel: (0, i)),      # hu tile
                pl.BlockSpec((D, tile_e), lambda i, rel: (0, i)),      # hv tile
                pl.BlockSpec((num_rels, D), lambda i, rel: (0, 0)),    # full W, resident
            ],
            out_specs=pl.BlockSpec((1, tile_e), lambda i, rel: (0, i)),
        ),
        compiler_params=pltpu.CompilerParams(
            dimension_semantics=("parallel",),
            vmem_limit_bytes=vmem_limit),
        cost_estimate=cost,
    )(rel_per_tile, hu_T, hv_T, w_rels)
    return out.reshape(E_pad)


# ----------------------------------------------------------------------------
# DistMultPredictor forward (JAX glue around the single fused kernel launch)
# ----------------------------------------------------------------------------
class DistMultPredictorJAX:
    """JAX/Pallas port of DistMultPredictor.forward.

    The DGL heterograph is replaced by an explicit dict
      edges[etype] = (src_idx, dst_idx)
    and node features h is a dict {node_type: (N_type, n_hid)} — exactly the
    tensors `apply_edges` reads (edges.src['h'], edges.dst['h']).
    """

    def __init__(self, n_hid, w_rels, rel2idx, tile_e=TILE_E):
        self.W = w_rels            # (num_rels, n_hid)
        self.rel2idx = rel2idx
        self.n_hid = n_hid
        self.etypes_all = ETYPES_ALL
        self.tile_e = tile_e

    def forward(self, edges, h, pretrain_mode):
        tile_e = self.tile_e
        if pretrain_mode:
            # matches: [i for i in graph.canonical_etypes if num_edges != 0]
            etypes = [et for et in edges if edges[et][0].shape[0] != 0]
        else:
            etypes = self.etypes_all
        # TODO(synk): graph.local_scope() / canonical_etypes / only_relation
        # filtering are DGL bookkeeping with no Pallas equivalent; the edge
        # dict passed in plays the role of the (possibly filtered) graph.

        # Stack node-type tables ONCE, feature-major (D, N_total); one gather
        # per side then writes the lane-dense (D, E_pad) slabs exactly once.
        offsets, tables = {}, []
        off = 0
        for ntype, tbl in h.items():
            offsets[ntype] = off
            off += tbl.shape[0]
            tables.append(tbl.T)                      # (D, N_type)
        h_all_T = jnp.concatenate(tables, axis=1)     # (D, N_total)

        src_rows, dst_rows, rel_per_tile, segs = [], [], [], []
        empty_idx = jnp.zeros((0,), jnp.int32)
        row = 0
        for etype in etypes:
            src_type, _, dst_type = etype
            src_idx, dst_idx = edges.get(etype, (empty_idx, empty_idx))
            E = int(src_idx.shape[0])
            if E == 0:
                segs.append((etype, 0, 0))
                continue
            n_tiles = -(-E // tile_e)
            e_pad = n_tiles * tile_e
            # Pad the cheap int32 index vectors (never the (E, D) embeddings);
            # padded rows gather global row 0 and are sliced off below.
            src_rows.append(jnp.pad(src_idx.astype(jnp.int32) + offsets[src_type],
                                    (0, e_pad - E)))
            dst_rows.append(jnp.pad(dst_idx.astype(jnp.int32) + offsets[dst_type],
                                    (0, e_pad - E)))
            rel_per_tile += [self.rel2idx[etype]] * n_tiles
            segs.append((etype, row, E))
            row += e_pad

        if row > 0:
            src_all = jnp.concatenate(src_rows)
            dst_all = jnp.concatenate(dst_rows)
            # TODO(synk): for node tables too large for a single jnp.take pass,
            # fuse the row gather into the kernel (memory_space=pl.ANY + per-tile
            # DMA gather from the scalar-prefetched index vectors).
            hu_T = jnp.take(h_all_T, src_all, axis=1)   # (D, E_pad), one HBM pass
            hv_T = jnp.take(h_all_T, dst_all, axis=1)
            rel_ids = jnp.asarray(rel_per_tile, dtype=jnp.int32)
            flat = distmult_edge_scores_fused(
                hu_T, hv_T, self.W, rel_ids,
                apply_sigmoid=pretrain_mode, tile_e=tile_e)
        else:
            flat = jnp.zeros((0,), jnp.float32)

        # segs preserves the iteration order of the reference (etypes_all in
        # finetune mode, filtered canonical order in pretrain mode), so the
        # s_l concatenation order matches torch.cat in the PyTorch module.
        scores, s_parts = {}, []
        for etype, start, E in segs:
            out = flat[start:start + E] if E > 0 else jnp.zeros((0,), jnp.float32)
            scores[etype] = out
            s_parts.append(out)
        s_l = jnp.concatenate(s_parts) if s_parts else jnp.zeros((0,), jnp.float32)
        if not pretrain_mode:
            # matches `.reshape(-1).detach().cpu().numpy()`
            s_l = np.asarray(s_l).reshape(-1)
        return scores, s_l


# ----------------------------------------------------------------------------
# Pure-JAX reference for correctness checking
# ----------------------------------------------------------------------------
def _reference_scores(h_u, h_v, w_rel, apply_sigmoid):
    s = jnp.sum(h_u * w_rel[None, :] * h_v, axis=1)
    return jax.nn.sigmoid(s) if apply_sigmoid else s


# ----------------------------------------------------------------------------
# Main
# ----------------------------------------------------------------------------
if __name__ == "__main__":
    n_hid = 32
    node_counts = {'drug': 10, 'disease': 12, 'gene/protein': 14}
    rel2idx = {et: i for i, et in enumerate(ETYPES_ALL)}
    num_rels = len(ETYPES_ALL)

    key = jax.random.PRNGKey(0)
    key, kW = jax.random.split(key)
    # deterministic synthetic parameters (shape matches nn.Parameter w_rels)
    w_rels = jax.random.normal(kW, (num_rels, n_hid), dtype=jnp.float32) * 0.1

    # node features h (output of the upstream RGCN encoder)
    h = {}
    for ntype, n in node_counts.items():
        key, k = jax.random.split(key)
        h[ntype] = jax.random.normal(k, (n, n_hid), dtype=jnp.float32)

    # deterministic synthetic edge lists per canonical etype
    edges = {}
    for i, et in enumerate(ETYPES_ALL):
        src_type, _, dst_type = et
        n_edges = 5 + (i % 4) * 3  # 5..14 edges, varies per etype
        key, ks, kd = jax.random.split(key, 3)
        src = jax.random.randint(ks, (n_edges,), 0, node_counts[src_type])
        dst = jax.random.randint(kd, (n_edges,), 0, node_counts[dst_type])
        edges[et] = (src, dst)

    model = DistMultPredictorJAX(n_hid, w_rels, rel2idx)

    ok = True
    for pretrain_mode in (False, True):
        scores, s_l = model.forward(edges, h, pretrain_mode)
        # block on kernel outputs
        for v in scores.values():
            jax.block_until_ready(v)
        if pretrain_mode:
            jax.block_until_ready(s_l)

        # verify against pure-JAX reference
        for et in scores:
            src_type, _, dst_type = et
            src_idx, dst_idx = edges[et]
            h_u = jnp.take(h[src_type], src_idx, axis=0)
            h_v = jnp.take(h[dst_type], dst_idx, axis=0)
            ref = _reference_scores(h_u, h_v, w_rels[rel2idx[et]], pretrain_mode)
            if not np.allclose(np.asarray(scores[et]), np.asarray(ref),
                               rtol=1e-4, atol=1e-5):
                ok = False

    print("KERNEL_OK" if ok else "KERNEL_MISMATCH")
</pallas_src>

<mosaic_0001>
module attributes {stable_mosaic.version = 11 : i64} {
  func.func @_distmult_fused_kernel(%arg0: i32, %arg1: memref<10xi32, #tpu.memory_space<smem>>, %arg2: memref<32x2048xf32, #tpu.memory_space<vmem>>, %arg3: memref<32x2048xf32, #tpu.memory_space<vmem>>, %arg4: memref<10x32xf32, #tpu.memory_space<vmem>>, %arg5: memref<1x2048xf32, #tpu.memory_space<vmem>>) attributes {dimension_semantics = [#tpu.dimension_semantics<parallel>], iteration_bounds = array<i64: 10>, scalar_prefetch = 1 : i64, scratch_operands = 0 : i64, tpu.core_type = #tpu.core_type<tc>, window_params = [{transform_indices = @transform_0, window_bounds = array<i64: 32, 2048>}, {transform_indices = @transform_1, window_bounds = array<i64: 32, 2048>}, {pipeline_mode = #tpu.pipeline_mode<synchronous>, transform_indices = @transform_2, window_bounds = array<i64: 10, 32>}, {transform_indices = @transform_3, window_bounds = array<i64: 1, 2048>}]} {
    %0 = arith.index_cast %arg0 : i32 to index
    %1 = memref.load %arg1[%0] : memref<10xi32, #tpu.memory_space<smem>>
    %2 = arith.index_cast %1 : i32 to index
    %c0 = arith.constant 0 : index
    %3 = vector.load %arg4[%2, %c0] : memref<10x32xf32, #tpu.memory_space<vmem>>, vector<1x32xf32>
    %c0_0 = arith.constant 0 : index
    %c0_1 = arith.constant 0 : index
    %4 = vector.load %arg2[%c0_0, %c0_1] : memref<32x2048xf32, #tpu.memory_space<vmem>>, vector<32x2048xf32>
    %c0_2 = arith.constant 0 : index
    %c0_3 = arith.constant 0 : index
    %5 = vector.load %arg3[%c0_2, %c0_3] : memref<32x2048xf32, #tpu.memory_space<vmem>>, vector<32x2048xf32>
    %6 = arith.mulf %4, %5 : vector<32x2048xf32>
    %cst = arith.constant dense<0.000000e+00> : vector<1x2048xf32>
    %7 = tpu.matmul %3, %6, %cst {dimension_numbers = #tpu.dot_dimension_numbers<[1], [0], [0], [1], [0, 0, 1, 1], [], []>, precision = #tpu.contract_precision<fp32>} : vector<1x32xf32>, vector<32x2048xf32>, vector<1x2048xf32> -> vector<1x2048xf32>
    %c0_4 = arith.constant 0 : index
    %c0_5 = arith.constant 0 : index
    %8 = vector.load %arg5[%c0_4, %c0_5] : memref<1x2048xf32, #tpu.memory_space<vmem>>, vector<1x2048xf32>
    tpu.vector_store %arg5[%c0_4, %c0_5], %7 {strides = array<i32>} : memref<1x2048xf32, #tpu.memory_space<vmem>>, vector<1x2048xf32>,
    return
  }
  func.func @transform_0(%arg0: i32, %arg1: memref<10xi32, #tpu.memory_space<smem>>) -> (i32, i32) {
    %c0_i32 = arith.constant 0 : i32
    %c0_i32_0 = arith.constant 0 : i32
    return %c0_i32, %arg0 : i32, i32
  }
  func.func @transform_1(%arg0: i32, %arg1: memref<10xi32, #tpu.memory_space<smem>>) -> (i32, i32) {
    %c0_i32 = arith.constant 0 : i32
    %c0_i32_0 = arith.constant 0 : i32
    return %c0_i32, %arg0 : i32, i32
  }
  func.func @transform_2(%arg0: i32, %arg1: memref<10xi32, #tpu.memory_space<smem>>) -> (i32, i32) {
    %c0_i32 = arith.constant 0 : i32
    %c0_i32_0 = arith.constant 0 : i32
    %c0_i32_1 = arith.constant 0 : i32
    return %c0_i32, %c0_i32_0 : i32, i32
  }
  func.func @transform_3(%arg0: i32, %arg1: memref<10xi32, #tpu.memory_space<smem>>) -> (i32, i32) {
    %c0_i32 = arith.constant 0 : i32
    %c0_i32_0 = arith.constant 0 : i32
    return %c0_i32, %arg0 : i32, i32
  }
}

</mosaic_0001>

<bundles_post_ra>
// kernel: tpu_custom_call.1
= control target key start
LH: loop header
LB: loop body
LE: loop exit
PB: predicated region body
PF: predicated region fallthrough
CT: control target
= control target key end

     0   :  { %s3862_s18 = smov [#allocation3]   ;;  %s5333_s0 = inlined_call_operand.hbm [shape: s32[10], index: 0, kind: input, shape index: {}]   ;;  %s5334_s1 = inlined_call_operand.hbm [shape: f32[32,20480], index: 1, kind: input, shape index: {}]   ;;  %s5335_s2 = inlined_call_operand.hbm [shape: f32[32,20480], index: 2, kind: input, shape index: {}]   ;;  %s5336_s3 = inlined_call_operand.hbm [shape: f32[10,32], index: 3, kind: input, shape index: {}]   ;;  %s5337_s4 = inlined_call_operand.hbm [shape: f32[1,20480], index: 4, kind: output, shape index: {}]  }
   0x1   :  { %5340 = sst [smem:[#allocation17_spill]] %s5334_s1  ;;  %s10_s17 = sshll.u32 %s5333_s0, 4  ;;  %s11_s17 = int_to_ptr.hbm [resolvable:$true] %s10_s17 }
   0x2   :  { %5341 = sst [smem:[#allocation18_spill]] %s5336_s3 }
   0x3   :  { %13 = dma.hbm_to_smem %s11_s17, 16, %s3862_s18, [#allocation2] }
   0x4   :  { %3828 = dma.done.wait [#allocation2], 16 }
   0x5   :  { %3829 = vsyncadd [#allocation2], 4294967280 }
   0x6   :  { %16 = sfence }
   0x7   :  { %17 = vsyncpa [#allocation5], 0 }
   0x8   :  { %19 = vsyncpa [#allocation5 + $0x1], 0 }
   0x9   :  { %20 = vsyncpa [#allocation8], 0 }
   0xa   :  { %22 = vsyncpa [#allocation8 + $0x1], 0 }
   0xb   :  { %23 = vsyncpa [#allocation6], 0 }
   0xc   :  { %25 = vsyncpa [#allocation6 + $0x1], 0  ;;  %s3896_s19 = smov 0   ;;  %s3898_s20 = smov 0  }
   0xd   :  { %s3900_s21 = smov 0   ;;  %s3902_s22 = smov 0  }
   0xe LB: > { %s3917_s0 = sadd.s32 4294967295, %s3860_s22   ;;  %s3594_s23 = sadd.s32 4294967294, %s3860_s22   ;;  %s3860_s22 = sphi %s3902_s22, %s5355_s22   ;;  %s3856_s21 = sphi %s3900_s21, %s5354_s21   ;;  %s3852_s20 = sphi %s3898_s20, %s5353_s20   ;;  %s3848_s19 = sphi %s3896_s19, %s5352_s19  }
   0xf   : > { %p51_p0 = scmp.ne.s32.totalorder %s3852_s20, %s3848_s19  ;;  %p52_p1 = scmp.eq.s32.totalorder %s3917_s0, 0 }
  0x10   : > { %p122_p2 = scmp.eq.s32.totalorder %s3917_s0, 9  ;;  %p128_p3 = scmp.eq.s32.totalorder %s3594_s23, 9 }
  0x11   : > { %p3926_p4 = por %p52_p1, %p51_p0  ;;  %p3595_p5 = scmp.ge.s32.totalorder %s3860_s22, 1 }
  0x12   : > { %p3931_p6 = por %p128_p3, %p51_p0  ;;  %p135_p7 = scmp.lt.s32.totalorder %s3860_s22, 11 }
  0x13   : > { %s5344_s3 = sld [smem:[#allocation18_spill]]  ;;  %s3863_s30 = smov [#allocation9]  }
  0x14   : > { %p3939_p8 = pnand %p3595_p5, %p135_p7  ;;  %s148_s5 = sshll.u32 %s3863_s30, 4  ;;  %s149_s5 = int_to_ptr.vmem [resolvable:$true] %s148_s5 }
  0x15   : > { %s3948_s6 = sadd.s32 1, %s3860_s22   ;;  %s5338_s7 = smov 128  }
  0x16   : > { %p3625_p9 = pneg %p3939_p8  ;;  %s3865_s8 = smov 8  }
  0x17   : > { %s35_s9 = ssub.s32 %s3860_s22, %s3948_s6  ;;  %s38_s10 = sadd.s32 1, %s3856_s21 }
  0x18   : > { %p3626_p10 = pnand %p3625_p9, %p52_p1  ;;  %p36_p11 = scmp.eq.s32.totalorder %s35_s9, 0 }
  0x19   : > { %s146_s28 = sshll.u32 %s5344_s3, 4  ;;  %p45_p12 = scmp.ne.s32.totalorder %s3856_s21, %s3852_s20  ;;  %s147_s28 = int_to_ptr.hbm [resolvable:$true] %s146_s28 }
  0x1a   : > { %3628 = dma.hbm_to_vmem [thread:$0]  (!%p3626_p10), %s147_s28, 256, %s149_s5, [#allocation8], %s5338_s7, %s5338_s7, %s3865_s8  }
  0x1b   : > { %p46_p13 = scmp.eq.s32.totalorder %s3860_s22, 0  ;;  %p3641_p0 = scmp.lt.s32.totalorder %s3860_s22, 10 }
  0x1c   : > { %s3960_s11 = scalar_select %p36_p11, %s3856_s21, %s38_s10  }
  0x1d   : > { %p47_p3 = por %p46_p13, %p45_p12  ;;  %p3964_p5 = por %p122_p2, %p45_p12 }
  0x1e   : > { %5346 = sst [smem:[#allocation16_spill]] %s3960_s11  ;;  %s162_s13 = sand.u32 1, %s3856_s21  }
  0x1f   : > { %s3613_s14 = sshll.u32 %s3860_s22, 7  ;;  %s3970_s15 = sshll.u32 %s162_s13, 9 }
  0x20   : > { %s5348_s1 = sld [smem:[#allocation17_spill]]  ;;  %s166_s26 = scalar_lea.vmem [#allocation4], %s3970_s15 }
  0x21   : > { %s174_s27 = sshll.u32 %s166_s26, 4  ;;  %p3978_p7 = pnand %p3641_p0, %p47_p3  ;;  %s175_s27 = int_to_ptr.vmem [resolvable:$true] %s174_s27 }
  0x22   : > { %s193_s8 = scalar_lea.hbm %s5335_s2, %s3613_s14  ;;  %s163_s9 = scalar_lea.sflag [#allocation5], %s162_s13 }
  0x23   : > { %p3728_p9 = pneg %p3978_p7 }
  0x26   : > { %s171_s18 = scalar_lea.hbm %s5348_s1, %s3613_s14  ;;  %s3731_s26 = scalar_lea.hbm %s5348_s1, 5120 }
  0x27   : > { %s172_s23 = sshll.u32 %s171_s18, 4  ;;  %s173_s23 = int_to_ptr.hbm [resolvable:$true] %s172_s23 }
  0x28   : > { %s3724_s10 = sshra.s32 %s173_s23, 4  ;;  %s3725_s10 = int_to_ptr.hbm [resolvable:$true] %s3724_s10 }
  0x29   : > { %s3726_s16 = scalar_lea.hbm %s3725_s10, 512  ;;  %p3732_p12 = scmp.lt.s32.totalorder %s3725_s10, %s5348_s1 }
  0x2a   : > { %p3727_p2 = scmp.ne.s32.totalorder %s3725_s10, %s3726_s16  ;;  %p3733_p13 = scmp.lt.s32.totalorder %s3731_s26, %s3726_s16 }
  0x2c   : > { %p3729_p10 = pnand %p3728_p9, %p3727_p2  ;;  %p3734_p0 = por %p3733_p13, %p3732_p12 }
  0x2e   : > { %p3730_p11 = pneg %p3729_p10 }
  0x30   : > { %p3735_p3 = pnand %p3734_p0, %p3730_p11 }
  0x32   : > { %3738 = shalt.err (!%p3735_p3)
}
  0x33   : > { %s3866_s13 = smov 20480   ;;  %s3867_s14 = smov 2048  }
  0x34   : > { %s5350_s5 = smov 128   ;;  %s194_s3 = sshll.u32 %s193_s8, 4  ;;  %s195_s3 = int_to_ptr.hbm [resolvable:$true] %s194_s3 }
  0x35   : > { %3632 = dma.hbm_to_vmem [thread:$0]  (!%p3978_p7), %s173_s23, 8192, %s175_s27, %s163_s9, %s3866_s13, %s3867_s14, %s5350_s5  }
  0x36   : > { %s188_s17 = scalar_lea.vmem [#allocation7], %s3970_s15  ;;  %s184_s7 = sand.u32 1, %s3860_s22  }
  0x37   : > { %s196_s18 = sshll.u32 %s188_s17, 4  ;;  %s185_s10 = scalar_lea.sflag [#allocation8], %s184_s7  ;;  %s197_s18 = int_to_ptr.vmem [resolvable:$true] %s196_s18 }
  0x38   : > { %s3754_s16 = sshra.s32 %s195_s3, 4  ;;  %s3761_s11 = scalar_lea.hbm %s5335_s2, 5120  ;;  %s3755_s16 = int_to_ptr.hbm [resolvable:$true] %s3754_s16 }
  0x39   : > { %s3756_s26 = scalar_lea.hbm %s3755_s16, 512  ;;  %p3762_p12 = scmp.lt.s32.totalorder %s3755_s16, %s5335_s2 }
  0x3a   : > { %p3757_p2 = scmp.ne.s32.totalorder %s3755_s16, %s3756_s26  ;;  %p3763_p13 = scmp.lt.s32.totalorder %s3761_s11, %s3756_s26 }
  0x3c   : > { %p3759_p10 = pnand %p3757_p2, %p3728_p9  ;;  %p3764_p0 = por %p3763_p13, %p3762_p12 }
  0x3e   : > { %p3760_p11 = pneg %p3759_p10 }
  0x40   : > { %p3765_p3 = pnand %p3764_p0, %p3760_p11 }
  0x42   : > { %3768 = shalt.err (!%p3765_p3)
}
  0x43   : > { %3635 = dma.hbm_to_vmem [thread:$0]  (!%p3978_p7), %s195_s3, 8192, %s197_s18, %s185_s10, %s3866_s13, %s3867_s14, %s5350_s5  }
  0x44   : > { %208 = sbr.rel (%p3939_p8) target bundleno = 468 (0x1d4), region = 32  ;;  %s4016_s15 = sand.u32 (!%p3939_p8), 1, %s3852_s20  }
  0x45   : > { %s3605_s1 = sshll.u32 (!%p3939_p8), %s4016_s15, 9  ;;  %s211_s8 = scalar_lea.sflag (!%p3939_p8), [#allocation5], %s4016_s15 }
  0x46   : > { %s4020_s9 = scalar_lea.vmem (!%p3939_p8), [#allocation4], %s3605_s1 }
  0x49   : > { %3831 = dma.done.wait (%p3926_p4), %s211_s8, 8192  }
  0x4a   : > { %3833 = vsyncadd (%p3926_p4), %s211_s8, 4294959104  ;;  %s220_s3 = sand.u32 1, %s3917_s0   ;;  %s4027_s11 = scalar_lea.vmem [#allocation7], %s3605_s1 }
  0x4b   : > { %s221_s29 = scalar_lea.sflag [#allocation8], %s220_s3 }
  0x4c   : > { %3835 = dma.done.wait (%p3926_p4), %s221_s29, 8192  }
  0x4d   : > { %3837 = vsyncadd (%p3926_p4), %s221_s29, 4294959104 }
  0x4e   : > { %3839 = dma.done.wait (%p52_p1), [#allocation8], 256  }
  0x4f   : > { %3841 = vsyncadd (%p52_p1), [#allocation8], 4294967040  ;;  %s261_s28 = sld [smem:[#allocation3 + %s3917_s0]]  ;;  %v312_v0 = vld [vmem:[%s4020_s9 + $0x180] sm:$0xff]  ;;  %vm456_vm0 = vcmask 261120   ;;  %v313_v15 = vld [vmem:[%s4020_s9 + $0x188] sm:$0xff] }
  0x50   : > { %v376_v1 = vld [vmem:[%s4027_s11 + $0x180] sm:$0xff]  ;;  %v377_v16 = vld [vmem:[%s4027_s11 + $0x188] sm:$0xff]  ;;  %v314_v62 = vld [vmem:[%s4020_s9 + $0x190] sm:$0xff]  ;;  %vm3450_vm1 = vcmask 1040384   ;;  %vm3452_vm2 = vcmask 1042434   ;;  %vm3454_vm3 = vcmask 1041408  }
  0x51   : > { %v296_v2 = vld [vmem:[%s4020_s9 + $0x100] sm:$0xff]  ;;  %v440_v3 = vmul.f32 %v376_v1, %v312_v0  ;;  %v297_v17 = vld [vmem:[%s4020_s9 + $0x108] sm:$0xff]  ;;  %v441_v21 = vmul.f32 %v377_v16, %v313_v15  ;;  %v378_v63 = vld [vmem:[%s4027_s11 + $0x190] sm:$0xff]  ;;  %vm3456_vm4 = vcmask 1044484   ;;  %vm3458_vm5 = vcmask 1046534   ;;  %s3608_s13 = sshll.u32 %s4016_s15, 4 }
  0x52   : > { %v360_v4 = vld [vmem:[%s4027_s11 + $0x100] sm:$0xff]  ;;  %v361_v22 = vld [vmem:[%s4027_s11 + $0x108] sm:$0xff]  ;;  %vm3460_vm6 = vcmask 1045508   ;;  %vm3462_vm7 = vcmask 1043456   ;;  %s5286_s14 = scalar_lea.vmem [#allocation10], %s3608_s13  ;;  %s3610_s5 = sshll.u32 %s3917_s0, 4 }
  0x53   : > { %v280_v5 = vld [vmem:[%s4020_s9 + $0x80] sm:$0xff]  ;;  %v424_v7 = vmul.f32 %v360_v4, %v296_v2  ;;  %v4046_v12 = vand.u32 4294901760, %v440_v3  ;;  %v281_v23 = vld [vmem:[%s4020_s9 + $0x88] sm:$0xff]  ;;  %v425_v27 = vmul.f32 %v361_v22, %v297_v17  ;;  %v4072_v32 = vand.u32 4294901760, %v441_v21  ;;  %v298_v4 = vld [vmem:[%s4020_s9 + $0x110] sm:$0xff]  ;;  %s3486_s7 = scalar_lea.hbm %s5337_s4, %s3610_s5  ;;  %s3488_s0 = sshll.u32 %s5286_s14, 4  ;;  %s3489_s0 = int_to_ptr.vmem [resolvable:$true] %s3488_s0 }
  0x54   : > { %v344_v6 = vld [vmem:[%s4027_s11 + $0x80] sm:$0xff]  ;;  %v345_v24 = vld [vmem:[%s4027_s11 + $0x88] sm:$0xff]  ;;  %v330_v17 = vld [vmem:[%s4027_s11 + $0x10] sm:$0xff]  ;;  %s3490_s10 = sshll.u32 %s3486_s7, 4  ;;  %s3476_s16 = scalar_lea.sflag [#allocation6], %s4016_s15  ;;  %s3491_s10 = int_to_ptr.hbm [resolvable:$true] %s3490_s10 }
  0x55   : > { %v408_v8 = vmul.f32 %v344_v6, %v280_v5  ;;  %v264_v9 = vld [vmem:[%s4020_s9] sm:$0xff]  ;;  %s262_s24 = scalar_lea.vmem [#allocation9], %s261_s28  ;;  %v4051_v18 = vand.u32 4294901760, %v424_v7  ;;  %473 = vmatpush.msra.mxu0 %v4046_v12  ;;  %v502_v25 = vsub.f32 %v440_v3, %v4046_v12  ;;  %573 = vmatpush.msra.mxu3 %v4046_v12  ;;  %v409_v28 = vmul.f32 %v345_v24, %v281_v23  ;;  %v265_v49 = vld [vmem:[%s4020_s9 + $0x8] sm:$0xff]  ;;  %v362_v5 = vld [vmem:[%s4027_s11 + $0x110] sm:$0xff]  ;;  %s3798_s26 = sshra.s32 %s3491_s10, 4  ;;  %s3799_s26 = int_to_ptr.hbm [resolvable:$true] %s3798_s26 }
  0x56   : > { %v328_v10 = vld [vmem:[%s4027_s11] sm:$0xff]  ;;  %v4078_v35 = vand.u32 4294901760, %v425_v27  ;;  %v4088_v40 = vsub.f32 %v441_v21, %v4072_v32  ;;  %v329_v50 = vld [vmem:[%s4027_s11 + $0x8] sm:$0xff]  ;;  %v442_v6 = vmul.f32 %v378_v63, %v314_v62  ;;  %v315_v21 = vld [vmem:[%s4020_s9 + $0x198] sm:$0xff]  ;;  %s3800_s30 = scalar_lea.hbm %s3799_s26, 16  ;;  %s3804_s1 = scalar_lea.hbm %s5337_s4, 160 }
  0x57   : > { %v263_v11 = vld [vmem:[%s262_s24] sm:$0x1]  ;;  %v392_v13 = vmul.f32 %v328_v10, %v264_v9  ;;  %v4053_v19 = vand.u32 4294901760, %v408_v8  ;;  %v508_v29 = vsub.f32 %v424_v7, %v4051_v18  ;;  %544 = vmatpush.msra.mxu2 %v502_v25  ;;  %475 = vmatpush.msra.mxu0 %v4051_v18  ;;  %v503_v33 = vand.u32 4294901760, %v502_v25  ;;  %v282_v9 = vld [vmem:[%s4020_s9 + $0x90] sm:$0xff]  ;;  %v379_v22 = vld [vmem:[%s4027_s11 + $0x198] sm:$0xff]  ;;  %p3801_p1 = scmp.ne.s32.totalorder %s3799_s26, %s3800_s30  ;;  %p3805_p7 = scmp.lt.s32.totalorder %s3799_s26, %s5337_s4 }
  0x58   : > { %v458_v14 = vsel %vm456_vm0, %v263_v11, 0  ;;  %v4080_v36 = vand.u32 4294901760, %v409_v28  ;;  %575 = vmatpush.msra.mxu3 %v4051_v18  ;;  %v4093_v43 = vsub.f32 %v425_v27, %v4078_v35  ;;  %v688_v48 = vand.u32 4294901760, %v4088_v40  ;;  %v346_v10 = vld [vmem:[%s4027_s11 + $0x90] sm:$0xff]  ;;  %v363_v27 = vld [vmem:[%s4027_s11 + $0x118] sm:$0xff]  ;;  %p3806_p9 = scmp.lt.s32.totalorder %s3804_s1, %s3800_s30 }
  0x59   : > { %v4055_v20 = vand.u32 4294901760, %v458_v14  ;;  %v4063_v26 = vand.u32 4294901760, %v392_v13  ;;  %v4067_v30 = vsub.f32 %v408_v8, %v4053_v19  ;;  %v509_v37 = vand.u32 4294901760, %v508_v29  ;;  %547 = vmatpush.msra.mxu2 %v508_v29  ;;  %477 = vmatpush.msra.mxu0 %v4053_v19  ;;  %p3802_p4 = pnand %p3801_p1, %p3964_p5 }
  0x5a   : > { %v504_v41 = vsub.f32 %v502_v25, %v503_v33  ;;  %v4096_v44 = vsub.f32 %v409_v28, %v4080_v36  ;;  %577 = vmatpush.msra.mxu3 %v4053_v19  ;;  %v694_v53 = vand.u32 4294901760, %v4093_v43  ;;  %v689_v57 = vsub.f32 %v4088_v40, %v688_v48  ;;  %v299_v25 = vld [vmem:[%s4020_s9 + $0x118] sm:$0xff]  ;;  %p3807_p2 = por %p3806_p9, %p3805_p7 }
  0x5b   : > { %v4070_v31 = vsub.f32 %v458_v14, %v4055_v20  ;;  %v4076_v34 = vsub.f32 %v392_v13, %v4063_v26  ;;  %v515_v39 = vand.u32 4294901760, %v4067_v30  ;;  %v510_v45 = vsub.f32 %v508_v29, %v509_v37  ;;  %550 = vmatpush.msra.mxu2 %v4067_v30  ;;  %479 = vmatpush.msra.mxu0 %v4063_v26  ;;  %v266_v14 = vld [vmem:[%s4020_s9 + $0x10] sm:$0xff]  ;;  %p3803_p8 = pneg %p3802_p4 }
  0x5c   : > { %v505_v51 = vand.u32 4294901760, %v504_v41  ;;  %v700_v54 = vand.u32 4294901760, %v4096_v44  ;;  %579 = vmatpush.msra.mxu3 %v4063_v26  ;;  %v695_v59 = vsub.f32 %v4093_v43, %v694_v53  ;;  %v393_v61 = vmul.f32 %v329_v50, %v265_v49  ;;  %v267_v41 = vld [vmem:[%s4020_s9 + $0x18] sm:$0xff] }
  0x5d   : > { %v4084_v38 = vand.u32 4294901760, %v4070_v31  ;;  %v521_v42 = vand.u32 4294901760, %v4076_v34  ;;  %v516_v47 = vsub.f32 %v4067_v30, %v515_v39  ;;  %v511_v55 = vand.u32 4294901760, %v510_v45  ;;  %602 = vmatpush.msrb.mxu0 %v503_v33  ;;  %553 = vmatpush.msra.mxu2 %v4076_v34  ;;  %p3808_p10 = pnand %p3807_p2, %p3803_p8 }
  0x5e   : > { %506 = vmatpush.msra.mxu1 %v505_v51  ;;  %v701_v60 = vsub.f32 %v4096_v44, %v700_v54  ;;  %556 = vmatmul.f32.vlgmr.msra.gmra.mxu2 %v4070_v31  ;;  %v690_v0 = vand.u32 4294901760, %v689_v57  ;;  %v696_v2 = vand.u32 4294901760, %v695_v59  ;;  %v4130_v3 = vand.u32 4294901760, %v393_v61 }
  0x5f   : > { %v483_v46 = vsub.f32 %v4070_v31, %v4084_v38  ;;  %v522_v52 = vsub.f32 %v4076_v34, %v521_v42  ;;  %v517_v58 = vand.u32 4294901760, %v516_v47  ;;  %583 = vmatmul.f32.vlgmr.msra.gmra.mxu3 %v4084_v38  ;;  %658 = vmatpush.msrb.mxu2 %v4072_v32  ;;  %v426_v11 = vmul.f32 %v362_v5, %v298_v4  ;;  %v283_v34 = vld [vmem:[%s4020_s9 + $0x98] sm:$0xff] }
  0x60   : > { %512 = vmatpush.msra.mxu1 %v511_v55  ;;  %691 = vmatpush.msrb.mxu3 %v690_v0  ;;  %v702_v7 = vand.u32 4294901760, %v701_v60  ;;  %v4136_v8 = vsub.f32 %v393_v61, %v4130_v3  ;;  %v4145_v15 = vand.u32 4294901760, %v442_v6  ;;  %v410_v16 = vmul.f32 %v346_v10, %v282_v9 }
  0x61   : > { %v4113_v56 = vand.u32 4294901760, %v483_v46  ;;  %v523_v1 = vand.u32 4294901760, %v522_v52  ;;  %606 = vmatpush.msrb.mxu0 %v509_v37  ;;  %660 = vmatpush.msrb.mxu2 %v4078_v35  ;;  %v4155_v24 = vand.u32 4294901760, %v426_v11  ;;  %v443_v29 = vmul.f32 %v379_v22, %v315_v21  ;;  %v347_v37 = vld [vmem:[%s4027_s11 + $0x98] sm:$0xff]  ;;  %v348_v21 = vld [vmem:[%s4027_s11 + $0xa0] sm:$0xff] }
  0x62   : > { %518 = vmatpush.msra.mxu1 %v517_v58  ;;  %697 = vmatpush.msrb.mxu3 %v696_v2  ;;  %v706_v13 = vand.u32 4294901760, %v4136_v8  ;;  %v4164_v30 = vsub.f32 %v442_v6, %v4145_v15  ;;  %v4166_v33 = vand.u32 4294901760, %v410_v16 }
  0x63   : > { %485 = vmatmul.f32.vlgmr.msra.gmra.mxu0 %v4113_v56  ;;  %662 = vmatpush.msrb.mxu2 %v4080_v36  ;;  %v4183_v46 = vand.u32 4294901760, %v443_v29 }
  0x64   : > { %524 = vmatpush.msra.mxu1 %v523_v1  ;;  %610 = vmatpush.msrb.mxu0 %v515_v39  ;;  %v707_v23 = vsub.f32 %v4136_v8, %v706_v13  ;;  %v4175_v39 = vsub.f32 %v426_v11, %v4155_v24  ;;  %v4190_v47 = vsub.f32 %v410_v16, %v4166_v33  ;;  %v300_v11 = vld [vmem:[%s4020_s9 + $0x120] sm:$0xff] }
  0x65   : > { %526 = vmatmul.f32.vlgmr.msra.gmra.mxu1 %v4055_v20  ;;  %703 = vmatpush.msrb.mxu3 %v702_v7  ;;  %v4206_v50 = vsub.f32 %v443_v29, %v4183_v46  ;;  %v316_v7 = vld [vmem:[%s4020_s9 + $0x1a0] sm:$0xff] }
  0x66   : > { %633 = vmatpush.msrb.mxu1 %v4046_v12  ;;  %664 = vmatpush.msrb.mxu2 %v4130_v3  ;;  %v708_v28 = vand.u32 4294901760, %v707_v23  ;;  %v394_v12 = vmul.f32 %v330_v17, %v266_v14  ;;  %v879_v49 = vand.u32 4294901760, %v4175_v39  ;;  %v885_v52 = vand.u32 4294901760, %v4190_v47  ;;  %v284_v17 = vld [vmem:[%s4020_s9 + $0xa0] sm:$0xff] }
  0x67   : > { %614 = vmatpush.msrb.mxu0 %v521_v42  ;;  %670 = vmatmul.f32.vlgmr.msrb.gmra.mxu2 %v4113_v56  ;;  %v331_v42 = vld [vmem:[%s4027_s11 + $0x18] sm:$0xff]  ;;  %v332_v29 = vld [vmem:[%s4027_s11 + $0x20] sm:$0xff] }
  0x68   : > { %635 = vmatpush.msrb.mxu1 %v4051_v18  ;;  %709 = vmatpush.msrb.mxu3 %v708_v28  ;;  %v427_v18 = vmul.f32 %v363_v27, %v299_v25  ;;  %v4181_v45 = vand.u32 4294901760, %v394_v12  ;;  %v886_v58 = vsub.f32 %v4190_v47, %v885_v52  ;;  %v317_v25 = vld [vmem:[%s4020_s9 + $0x1a8] sm:$0xff]  ;;  %v412_v28 = vmul.f32 %v348_v21, %v284_v17  ;;  %v302_v17 = vld [vmem:[%s4020_s9 + $0x130] sm:$0xff] }
  0x69   : > { %729 = vmatpush.msra.mxu0 %v4088_v40  ;;  %711 = vmatmul.f32.vlgmr.msrb.gmra.mxu3 %v4055_v20  ;;  %v873_v40 = vand.u32 4294901760, %v4164_v30  ;;  %v366_v21 = vld [vmem:[%s4027_s11 + $0x130] sm:$0xff] }
  0x6a   : > { %637 = vmatpush.msrb.mxu1 %v4053_v19  ;;  %787 = vmatpush.msra.mxu2 %v688_v48  ;;  %v411_v19 = vmul.f32 %v347_v37, %v283_v34  ;;  %v395_v48 = vmul.f32 %v331_v42, %v267_v41  ;;  %v887_v1 = vand.u32 4294901760, %v886_v58  ;;  %v365_v37 = vld [vmem:[%s4027_s11 + $0x128] sm:$0xff]  ;;  %v4311_v41 = vand.u32 4294901760, %v412_v28 }
  0x6b   : > { %616 = vmatmul.f32.vlgmr.msrb.gmra.mxu0 %v4055_v20  ;;  %818 = vmatpush.msra.mxu3 %v4072_v32  ;;  %v285_v42 = vld [vmem:[%s4020_s9 + $0xa8] sm:$0xff] }
  0x6c   : > { %639 = vmatpush.msrb.mxu1 %v4063_v26  ;;  %791 = vmatpush.msra.mxu2 %v694_v53  ;;  %v4194_v26 = vand.u32 4294901760, %v427_v18  ;;  %v4208_v51 = vand.u32 4294901760, %v411_v19  ;;  %v4220_v53 = vand.u32 4294901760, %v395_v48 }
  0x6d   : > { %732 = vmatpush.msra.mxu0 %v4093_v43  ;;  %820 = vmatpush.msra.mxu3 %v4078_v35  ;;  %v4203_v43 = vsub.f32 %v394_v12, %v4181_v45  ;;  %v268_v12 = vld [vmem:[%s4020_s9 + $0x20] sm:$0xff] }
  0x6e   : > { %641 = vmatmul.f32.vlgmr.msrb.gmra.mxu1 %v4055_v20  ;;  %795 = vmatpush.msra.mxu2 %v700_v54  ;;  %v1058_v54 = vand.u32 4294901760, %v4206_v50  ;;  %v4232_v57 = vsub.f32 %v411_v19, %v4208_v51  ;;  %v4243_v60 = vsub.f32 %v395_v48, %v4220_v53  ;;  %v349_v19 = vld [vmem:[%s4027_s11 + $0xa8] sm:$0xff] }
  0x6f   : > { %758 = vmatpush.msra.mxu1 %v4072_v32  ;;  %735 = vmatpush.msra.mxu0 %v4096_v44  ;;  %v874_v32 = vsub.f32 %v4164_v30, %v873_v40  ;;  %v4218_v44 = vsub.f32 %v427_v18, %v4194_v26  ;;  %v891_v55 = vand.u32 4294901760, %v4203_v43  ;;  %v396_v18 = vmul.f32 %v332_v29, %v268_v12  ;;  %v333_v48 = vld [vmem:[%s4027_s11 + $0x28] sm:$0xff] }
  0x70   : > { %822 = vmatpush.msra.mxu3 %v4080_v36  ;;  %799 = vmatpush.msra.mxu2 %v706_v13  ;;  %v1059_v62 = vsub.f32 %v4206_v50, %v1058_v54  ;;  %v1070_v0 = vand.u32 4294901760, %v4232_v57  ;;  %v364_v13 = vld [vmem:[%s4027_s11 + $0x120] sm:$0xff]  ;;  %v430_v12 = vmul.f32 %v366_v21, %v302_v17 }
  0x71   : > { %760 = vmatpush.msra.mxu1 %v4078_v35  ;;  %738 = vmatpush.msra.mxu0 %v4136_v8  ;;  %v880_v35 = vsub.f32 %v4175_v39, %v879_v49  ;;  %v1064_v59 = vand.u32 4294901760, %v4218_v44  ;;  %v892_v63 = vsub.f32 %v4203_v43, %v891_v55  ;;  %v380_v8 = vld [vmem:[%s4027_s11 + $0x1a0] sm:$0xff]  ;;  %v428_v22 = vmul.f32 %v364_v13, %v300_v11  ;;  %v318_v11 = vld [vmem:[%s4020_s9 + $0x1b0] sm:$0xff] }
  0x72   : > { %824 = vmatpush.msra.mxu3 %v4130_v3  ;;  %801 = vmatmul.f32.vlgmr.msra.gmra.mxu2 %v4055_v20  ;;  %v1060_v4 = vand.u32 4294901760, %v1059_v62  ;;  %v1071_v6 = vsub.f32 %v4232_v57, %v1070_v0  ;;  %v444_v14 = vmul.f32 %v380_v8, %v316_v7  ;;  %v382_v13 = vld [vmem:[%s4027_s11 + $0x1b0] sm:$0xff]  ;;  %v320_v17 = vld [vmem:[%s4020_s9 + $0x1c0] sm:$0xff] }
  0x73   : > { %741 = vmatmul.f32.vlgmr.msra.gmra.mxu0 %v4070_v31  ;;  %762 = vmatpush.msra.mxu1 %v4080_v36  ;;  %v875_v36 = vand.u32 4294901760, %v874_v32  ;;  %v881_v61 = vand.u32 4294901760, %v880_v35  ;;  %v1065_v2 = vsub.f32 %v4218_v44, %v1064_v59  ;;  %v893_v5 = vand.u32 4294901760, %v892_v63  ;;  %v384_v21 = vld [vmem:[%s4027_s11 + $0x1c0] sm:$0xff] }
  0x74   : > { %826 = vmatmul.f32.vlgmr.msra.gmra.mxu3 %v4055_v20  ;;  %914 = vmatpush.msrb.mxu2 %v4164_v30  ;;  %v1072_v16 = vand.u32 4294901760, %v1071_v6  ;;  %v4291_v27 = vand.u32 4294901760, %v444_v14  ;;  %v381_v30 = vld [vmem:[%s4027_s11 + $0x1a8] sm:$0xff]  ;;  %v4300_v34 = vand.u32 4294901760, %v428_v22  ;;  %v413_v32 = vmul.f32 %v349_v19, %v285_v42  ;;  %v367_v19 = vld [vmem:[%s4027_s11 + $0x138] sm:$0xff] }
  0x75   : > { %843 = vmatpush.msrb.mxu0 %v4145_v15  ;;  %943 = vmatpush.msrb.mxu3 %v4145_v15  ;;  %v1066_v9 = vand.u32 4294901760, %v1065_v2  ;;  %v4448_v42 = vand.u32 4294901760, %v430_v12 }
  0x76   : > { %764 = vmatpush.msra.mxu1 %v4130_v3  ;;  %917 = vmatpush.msrb.mxu2 %v4175_v39  ;;  %v1076_v3 = vand.u32 4294901760, %v4243_v60  ;;  %v445_v39 = vmul.f32 %v381_v30, %v317_v25  ;;  %v286_v25 = vld [vmem:[%s4020_s9 + $0xb0] sm:$0xff]  ;;  %v319_v30 = vld [vmem:[%s4020_s9 + $0x1b8] sm:$0xff] }
  0x77   : > { %845 = vmatpush.msrb.mxu0 %v4155_v24  ;;  %945 = vmatpush.msrb.mxu3 %v4155_v24 }
  0x78   : > { %768 = vmatmul.f32.vlgmr.msra.gmra.mxu1 %v4084_v38  ;;  %920 = vmatpush.msrb.mxu2 %v4190_v47  ;;  %v1077_v10 = vsub.f32 %v4243_v60, %v1076_v3  ;;  %v4321_v47 = vsub.f32 %v428_v22, %v4300_v34  ;;  %v446_v22 = vmul.f32 %v382_v13, %v318_v11 }
  0x79   : > { %876 = vmatpush.msrb.mxu1 %v875_v36  ;;  %847 = vmatpush.msrb.mxu0 %v4166_v33  ;;  %v4354_v36 = vand.u32 4294901760, %v413_v32 }
  0x7a   : > { %947 = vmatpush.msrb.mxu3 %v4166_v33  ;;  %923 = vmatpush.msrb.mxu2 %v4203_v43  ;;  %v1078_v23 = vand.u32 4294901760, %v1077_v10  ;;  %v4329_v43 = vand.u32 4294901760, %v445_v39 }
  0x7b   : > { %882 = vmatpush.msrb.mxu1 %v881_v61  ;;  %849 = vmatpush.msrb.mxu0 %v4181_v45  ;;  %v4380_v62 = vsub.f32 %v413_v32, %v4354_v36  ;;  %v351_v32 = vld [vmem:[%s4027_s11 + $0xb8] sm:$0xff] }
  0x7c   : > { %949 = vmatpush.msrb.mxu3 %v4181_v45  ;;  %855 = vmatmul.f32.vlgmr.msrb.gmra.mxu0 %v4113_v56 }
  0x7d   : > { %888 = vmatpush.msrb.mxu1 %v887_v1  ;;  %926 = vmatmul.f32.vlgmr.msrb.gmra.mxu2 %v4070_v31 }
  0x7e   : > { %953 = vmatmul.f32.vlgmr.msrb.gmra.mxu3 %v4084_v38  ;;  %1028 = vmatpush.msra.mxu2 %v4183_v46 }
  0x7f   : > { %972 = vmatpush.msra.mxu0 %v873_v40  ;;  %1061 = vmatpush.msra.mxu3 %v1060_v4  ;;  %v1440_v4 = vand.u32 4294901760, %v4380_v62 }
  0x80   : > { %894 = vmatpush.msrb.mxu1 %v893_v5  ;;  %1030 = vmatpush.msra.mxu2 %v4194_v26 }
  0x81   : > { %976 = vmatpush.msra.mxu0 %v879_v49  ;;  %1067 = vmatpush.msra.mxu3 %v1066_v9  ;;  %v4327_v49 = vand.u32 4294901760, %v396_v18  ;;  %v1441_v10 = vsub.f32 %v4380_v62, %v1440_v4 }
  0x82   : > { %896 = vmatmul.f32.vlgmr.msrb.gmra.mxu1 %v4055_v20  ;;  %1032 = vmatpush.msra.mxu2 %v4208_v51 }
  0x83   : > { %1003 = vmatpush.msra.mxu1 %v4145_v15  ;;  %980 = vmatpush.msra.mxu0 %v885_v52  ;;  %v301_v15 = vld [vmem:[%s4020_s9 + $0x128] sm:$0xff]  ;;  %v4336_v52 = vsub.f32 %v412_v28, %v4311_v41  ;;  %v350_v28 = vld [vmem:[%s4027_s11 + $0xb0] sm:$0xff] }
  0x84   : > { %1073 = vmatpush.msra.mxu3 %v1072_v16  ;;  %1034 = vmatpush.msra.mxu2 %v4220_v53  ;;  %v429_v40 = vmul.f32 %v365_v37, %v301_v15  ;;  %v4439_v15 = vand.u32 4294901760, %v446_v22  ;;  %v414_v37 = vmul.f32 %v350_v28, %v286_v25  ;;  %v304_v25 = vld [vmem:[%s4020_s9 + $0x140] sm:$0xff] }
  0x85   : > { %1005 = vmatpush.msra.mxu1 %v4155_v24  ;;  %984 = vmatpush.msra.mxu0 %v891_v55  ;;  %v4309_v24 = vsub.f32 %v444_v14, %v4291_v27  ;;  %v4352_v55 = vsub.f32 %v445_v39, %v4329_v43  ;;  %v334_v39 = vld [vmem:[%s4027_s11 + $0x30] sm:$0xff]  ;;  %v368_v28 = vld [vmem:[%s4027_s11 + $0x140] sm:$0xff] }
  0x86   : > { %1079 = vmatpush.msra.mxu3 %v1078_v23  ;;  %986 = vmatmul.f32.vlgmr.msra.gmra.mxu0 %v4055_v20  ;;  %v1442_v23 = vand.u32 4294901760, %v1441_v10 }
  0x87   : > { %1007 = vmatpush.msra.mxu1 %v4166_v33  ;;  %1040 = vmatmul.f32.vlgmr.msra.gmra.mxu2 %v4113_v56  ;;  %v269_v33 = vld [vmem:[%s4020_s9 + $0x28] sm:$0xff] }
  0x88   : > { %1081 = vmatmul.f32.vlgmr.msra.gmra.mxu3 %v4055_v20  ;;  %1157 = vmatpush.msrb.mxu2 %v1058_v54  ;;  %v397_v35 = vmul.f32 %v333_v48, %v269_v33  ;;  %v1249_v54 = vand.u32 4294901760, %v4321_v47  ;;  %v4459_v33 = vand.u32 4294901760, %v414_v37  ;;  %v287_v48 = vld [vmem:[%s4020_s9 + $0xb8] sm:$0xff] }
  0x89   : > { %1099 = vmatpush.msrb.mxu0 %v4206_v50  ;;  %1188 = vmatpush.msrb.mxu3 %v4183_v46  ;;  %v1243_v50 = vand.u32 4294901760, %v4309_v24 }
  0x8a   : > { %1009 = vmatpush.msra.mxu1 %v4181_v45  ;;  %1161 = vmatpush.msrb.mxu2 %v1064_v59  ;;  %v4340_v45 = vand.u32 4294901760, %v429_v40  ;;  %v4368_v59 = vand.u32 4294901760, %v397_v35 }
  0x8b   : > { %1102 = vmatpush.msrb.mxu0 %v4218_v44  ;;  %1190 = vmatpush.msrb.mxu3 %v4194_v26  ;;  %v4349_v44 = vsub.f32 %v396_v18, %v4327_v49  ;;  %v270_v18 = vld [vmem:[%s4020_s9 + $0x30] sm:$0xff] }
  0x8c   : > { %1011 = vmatmul.f32.vlgmr.msra.gmra.mxu1 %v4055_v20  ;;  %1165 = vmatpush.msrb.mxu2 %v1070_v0  ;;  %v4366_v58 = vsub.f32 %v429_v40, %v4340_v45  ;;  %v4391_v1 = vsub.f32 %v397_v35, %v4368_v59  ;;  %v398_v40 = vmul.f32 %v334_v39, %v270_v18  ;;  %v335_v35 = vld [vmem:[%s4027_s11 + $0x38] sm:$0xff] }
  0x8d   : > { %1128 = vmatpush.msrb.mxu1 %v4183_v46  ;;  %1105 = vmatpush.msrb.mxu0 %v4232_v57  ;;  %v1244_v46 = vsub.f32 %v4309_v24, %v1243_v50  ;;  %v1255_v57 = vand.u32 4294901760, %v4336_v52  ;;  %v1261_v61 = vand.u32 4294901760, %v4349_v44  ;;  %v432_v18 = vmul.f32 %v368_v28, %v304_v25  ;;  %v322_v25 = vld [vmem:[%s4020_s9 + $0x1d0] sm:$0xff] }
  0x8e   : > { %1192 = vmatpush.msrb.mxu3 %v4208_v51  ;;  %1169 = vmatpush.msrb.mxu2 %v1076_v3  ;;  %v1434_v0 = vand.u32 4294901760, %v4366_v58  ;;  %v1446_v7 = vand.u32 4294901760, %v4391_v1  ;;  %v386_v28 = vld [vmem:[%s4027_s11 + $0x1d0] sm:$0xff] }
  0x8f   : > { %1130 = vmatpush.msrb.mxu1 %v4194_v26  ;;  %1108 = vmatpush.msrb.mxu0 %v4243_v60  ;;  %v1250_v26 = vsub.f32 %v4321_v47, %v1249_v54  ;;  %v1428_v60 = vand.u32 4294901760, %v4352_v55  ;;  %v1256_v63 = vsub.f32 %v4336_v52, %v1255_v57 }
  0x90   : > { %1194 = vmatpush.msrb.mxu3 %v4220_v53  ;;  %1111 = vmatmul.f32.vlgmr.msrb.gmra.mxu0 %v4070_v31  ;;  %v1435_v6 = vsub.f32 %v4366_v58, %v1434_v0  ;;  %v1447_v16 = vsub.f32 %v4391_v1, %v1446_v7 }
  0x91   : > { %1132 = vmatpush.msrb.mxu1 %v4208_v51  ;;  %1171 = vmatmul.f32.vlgmr.msrb.gmra.mxu2 %v4055_v20  ;;  %v1245_v51 = vand.u32 4294901760, %v1244_v46  ;;  %v1251_v2 = vand.u32 4294901760, %v1250_v26  ;;  %v1429_v3 = vsub.f32 %v4352_v55, %v1428_v60  ;;  %v1257_v5 = vand.u32 4294901760, %v1256_v63 }
  0x92   : > { %1196 = vmatmul.f32.vlgmr.msrb.gmra.mxu3 %v4055_v20  ;;  %1284 = vmatpush.msra.mxu2 %v4309_v24  ;;  %v1436_v14 = vand.u32 4294901760, %v1435_v6  ;;  %v1448_v29 = vand.u32 4294901760, %v1447_v16  ;;  %v383_v24 = vld [vmem:[%s4027_s11 + $0x1b8] sm:$0xff]  ;;  %v415_v46 = vmul.f32 %v351_v32, %v287_v48  ;;  %v4596_v48 = vand.u32 4294901760, %v432_v18  ;;  %v369_v32 = vld [vmem:[%s4027_s11 + $0x148] sm:$0xff] }
  0x93   : > { %1213 = vmatpush.msra.mxu0 %v4291_v27  ;;  %1313 = vmatpush.msra.mxu3 %v4291_v27  ;;  %v1430_v8 = vand.u32 4294901760, %v1429_v3 }
  0x94   : > { %1134 = vmatpush.msrb.mxu1 %v4220_v53  ;;  %1287 = vmatpush.msra.mxu2 %v4321_v47  ;;  %v1262_v53 = vsub.f32 %v4349_v44, %v1261_v61  ;;  %v447_v47 = vmul.f32 %v383_v24, %v319_v30  ;;  %v288_v30 = vld [vmem:[%s4020_s9 + $0xc0] sm:$0xff]  ;;  %v321_v24 = vld [vmem:[%s4020_s9 + $0x1c8] sm:$0xff] }
  0x95   : > { %1215 = vmatpush.msra.mxu0 %v4300_v34  ;;  %1315 = vmatpush.msra.mxu3 %v4300_v34 }
  0x96   : > { %1138 = vmatmul.f32.vlgmr.msrb.gmra.mxu1 %v4084_v38  ;;  %1290 = vmatpush.msra.mxu2 %v4336_v52  ;;  %v1263_v9 = vand.u32 4294901760, %v1262_v53  ;;  %v4469_v52 = vsub.f32 %v430_v12, %v4448_v42  ;;  %v448_v12 = vmul.f32 %v384_v21, %v320_v17 }
  0x97   : > { %1246 = vmatpush.msra.mxu1 %v1245_v51  ;;  %1217 = vmatpush.msra.mxu0 %v4311_v41  ;;  %v4502_v51 = vand.u32 4294901760, %v415_v46 }
  0x98   : > { %1317 = vmatpush.msra.mxu3 %v4311_v41  ;;  %1293 = vmatpush.msra.mxu2 %v4349_v44  ;;  %v4477_v44 = vand.u32 4294901760, %v447_v47 }
  0x99   : > { %1252 = vmatpush.msra.mxu1 %v1251_v2  ;;  %1219 = vmatpush.msra.mxu0 %v4327_v49  ;;  %v4528_v3 = vsub.f32 %v415_v46, %v4502_v51  ;;  %v353_v46 = vld [vmem:[%s4027_s11 + $0xc8] sm:$0xff] }
  0x9a   : > { %1319 = vmatpush.msra.mxu3 %v4327_v49  ;;  %1225 = vmatmul.f32.vlgmr.msra.gmra.mxu0 %v4113_v56 }
  0x9b   : > { %1258 = vmatpush.msra.mxu1 %v1257_v5  ;;  %1296 = vmatmul.f32.vlgmr.msra.gmra.mxu2 %v4070_v31 }
  0x9c   : > { %1323 = vmatmul.f32.vlgmr.msra.gmra.mxu3 %v4084_v38  ;;  %1398 = vmatpush.msrb.mxu2 %v4329_v43 }
  0x9d   : > { %1342 = vmatpush.msrb.mxu0 %v1243_v50  ;;  %1431 = vmatpush.msrb.mxu3 %v1430_v8  ;;  %v1810_v8 = vand.u32 4294901760, %v4528_v3 }
  0x9e   : > { %1264 = vmatpush.msra.mxu1 %v1263_v9  ;;  %1400 = vmatpush.msrb.mxu2 %v4340_v45 }
  0x9f   : > { %1346 = vmatpush.msrb.mxu0 %v1249_v54  ;;  %1437 = vmatpush.msrb.mxu3 %v1436_v14  ;;  %v4475_v54 = vand.u32 4294901760, %v398_v40  ;;  %v1811_v16 = vsub.f32 %v4528_v3, %v1810_v8 }
  0xa0   : > { %1266 = vmatmul.f32.vlgmr.msra.gmra.mxu1 %v4055_v20  ;;  %1402 = vmatpush.msrb.mxu2 %v4354_v36 }
  0xa1   : > { %1373 = vmatpush.msrb.mxu1 %v4291_v27  ;;  %1350 = vmatpush.msrb.mxu0 %v1255_v57  ;;  %v303_v27 = vld [vmem:[%s4020_s9 + $0x138] sm:$0xff]  ;;  %v4484_v57 = vsub.f32 %v414_v37, %v4459_v33  ;;  %v352_v37 = vld [vmem:[%s4027_s11 + $0xc0] sm:$0xff] }
  0xa2   : > { %1443 = vmatpush.msrb.mxu3 %v1442_v23  ;;  %1404 = vmatpush.msrb.mxu2 %v4368_v59  ;;  %v431_v50 = vmul.f32 %v367_v19, %v303_v27  ;;  %v4587_v27 = vand.u32 4294901760, %v448_v12  ;;  %v416_v19 = vmul.f32 %v352_v37, %v288_v30  ;;  %v306_v30 = vld [vmem:[%s4020_s9 + $0x150] sm:$0xff] }
  0xa3   : > { %1375 = vmatpush.msrb.mxu1 %v4300_v34  ;;  %1354 = vmatpush.msrb.mxu0 %v1261_v61  ;;  %v4457_v34 = vsub.f32 %v446_v22, %v4439_v15  ;;  %v4500_v61 = vsub.f32 %v447_v47, %v4477_v44  ;;  %v336_v47 = vld [vmem:[%s4027_s11 + $0x40] sm:$0xff]  ;;  %v370_v37 = vld [vmem:[%s4027_s11 + $0x150] sm:$0xff] }
  0xa4   : > { %1449 = vmatpush.msrb.mxu3 %v1448_v29  ;;  %1356 = vmatmul.f32.vlgmr.msrb.gmra.mxu0 %v4055_v20  ;;  %v1812_v29 = vand.u32 4294901760, %v1811_v16 }
  0xa5   : > { %1377 = vmatpush.msrb.mxu1 %v4311_v41  ;;  %1410 = vmatmul.f32.vlgmr.msrb.gmra.mxu2 %v4113_v56  ;;  %v271_v41 = vld [vmem:[%s4020_s9 + $0x38] sm:$0xff] }
  0xa6   : > { %1451 = vmatmul.f32.vlgmr.msrb.gmra.mxu3 %v4055_v20  ;;  %1527 = vmatpush.msra.mxu2 %v1428_v60  ;;  %v399_v26 = vmul.f32 %v335_v35, %v271_v41  ;;  %v1619_v60 = vand.u32 4294901760, %v4469_v52  ;;  %v4607_v41 = vand.u32 4294901760, %v416_v19  ;;  %v289_v35 = vld [vmem:[%s4020_s9 + $0xc8] sm:$0xff] }
  0xa7   : > { %1469 = vmatpush.msra.mxu0 %v4352_v55  ;;  %1558 = vmatpush.msra.mxu3 %v4329_v43  ;;  %v1613_v55 = vand.u32 4294901760, %v4457_v34 }
  0xa8   : > { %1379 = vmatpush.msrb.mxu1 %v4327_v49  ;;  %1531 = vmatpush.msra.mxu2 %v1434_v0  ;;  %v4488_v49 = vand.u32 4294901760, %v431_v50  ;;  %v4516_v0 = vand.u32 4294901760, %v399_v26 }
  0xa9   : > { %1472 = vmatpush.msra.mxu0 %v4366_v58  ;;  %1560 = vmatpush.msra.mxu3 %v4340_v45  ;;  %v4497_v58 = vsub.f32 %v398_v40, %v4475_v54  ;;  %v272_v40 = vld [vmem:[%s4020_s9 + $0x40] sm:$0xff] }
  0xaa   : > { %1381 = vmatmul.f32.vlgmr.msrb.gmra.mxu1 %v4055_v20  ;;  %1535 = vmatpush.msra.mxu2 %v1440_v4  ;;  %v4514_v63 = vsub.f32 %v431_v50, %v4488_v49  ;;  %v4539_v5 = vsub.f32 %v399_v26, %v4516_v0  ;;  %v400_v50 = vmul.f32 %v336_v47, %v272_v40  ;;  %v337_v26 = vld [vmem:[%s4027_s11 + $0x48] sm:$0xff] }
  0xab   : > { %1498 = vmatpush.msra.mxu1 %v4329_v43  ;;  %1475 = vmatpush.msra.mxu0 %v4380_v62  ;;  %v1614_v43 = vsub.f32 %v4457_v34, %v1613_v55  ;;  %v1625_v62 = vand.u32 4294901760, %v4484_v57  ;;  %v1631_v2 = vand.u32 4294901760, %v4497_v58  ;;  %v434_v40 = vmul.f32 %v370_v37, %v306_v30 }
  0xac   : > { %1562 = vmatpush.msra.mxu3 %v4354_v36  ;;  %1539 = vmatpush.msra.mxu2 %v1446_v7  ;;  %v1804_v4 = vand.u32 4294901760, %v4514_v63  ;;  %v1816_v11 = vand.u32 4294901760, %v4539_v5 }
  0xad   : > { %1500 = vmatpush.msra.mxu1 %v4340_v45  ;;  %1478 = vmatpush.msra.mxu0 %v4391_v1  ;;  %v1620_v45 = vsub.f32 %v4469_v52, %v1619_v60  ;;  %v1798_v1 = vand.u32 4294901760, %v4500_v61  ;;  %v1626_v53 = vsub.f32 %v4484_v57, %v1625_v62 }
  0xae   : > { %1564 = vmatpush.msra.mxu3 %v4368_v59  ;;  %1481 = vmatmul.f32.vlgmr.msra.gmra.mxu0 %v4070_v31  ;;  %v1805_v10 = vsub.f32 %v4514_v63, %v1804_v4  ;;  %v1817_v23 = vsub.f32 %v4539_v5, %v1816_v11 }
  0xaf   : > { %1502 = vmatpush.msra.mxu1 %v4354_v36  ;;  %1541 = vmatmul.f32.vlgmr.msra.gmra.mxu2 %v4055_v20  ;;  %v1615_v36 = vand.u32 4294901760, %v1614_v43  ;;  %v1621_v6 = vand.u32 4294901760, %v1620_v45  ;;  %v1799_v7 = vsub.f32 %v4500_v61, %v1798_v1  ;;  %v1627_v9 = vand.u32 4294901760, %v1626_v53 }
  0xb0   : > { %1566 = vmatmul.f32.vlgmr.msra.gmra.mxu3 %v4055_v20  ;;  %1654 = vmatpush.msrb.mxu2 %v4457_v34  ;;  %v1806_v22 = vand.u32 4294901760, %v1805_v10  ;;  %v1818_v39 = vand.u32 4294901760, %v1817_v23  ;;  %v385_v34 = vld [vmem:[%s4027_s11 + $0x1c8] sm:$0xff]  ;;  %v417_v43 = vmul.f32 %v353_v46, %v289_v35  ;;  %v387_v35 = vld [vmem:[%s4027_s11 + $0x1d8] sm:$0xff]  ;;  %v4744_v46 = vand.u32 4294901760, %v434_v40 }
  0xb1   : > { %1583 = vmatpush.msrb.mxu0 %v4439_v15  ;;  %1683 = vmatpush.msrb.mxu3 %v4439_v15  ;;  %v1800_v13 = vand.u32 4294901760, %v1799_v7 }
  0xb2   : > { %1504 = vmatpush.msra.mxu1 %v4368_v59  ;;  %1657 = vmatpush.msrb.mxu2 %v4469_v52  ;;  %v1632_v59 = vsub.f32 %v4497_v58, %v1631_v2  ;;  %v449_v52 = vmul.f32 %v385_v34, %v321_v24  ;;  %v290_v24 = vld [vmem:[%s4020_s9 + $0xd0] sm:$0xff]  ;;  %v323_v34 = vld [vmem:[%s4020_s9 + $0x1d8] sm:$0xff] }
  0xb3   : > { %1585 = vmatpush.msrb.mxu0 %v4448_v42  ;;  %1685 = vmatpush.msrb.mxu3 %v4448_v42 }
  0xb4   : > { %1508 = vmatmul.f32.vlgmr.msra.gmra.mxu1 %v4084_v38  ;;  %1660 = vmatpush.msrb.mxu2 %v4484_v57  ;;  %v1633_v14 = vand.u32 4294901760, %v1632_v59  ;;  %v4617_v57 = vsub.f32 %v432_v18, %v4596_v48  ;;  %v450_v18 = vmul.f32 %v386_v28, %v322_v25 }
  0xb5   : > { %1616 = vmatpush.msrb.mxu1 %v1615_v36  ;;  %1587 = vmatpush.msrb.mxu0 %v4459_v33  ;;  %v4650_v36 = vand.u32 4294901760, %v417_v43 }
  0xb6   : > { %1687 = vmatpush.msrb.mxu3 %v4459_v33  ;;  %1663 = vmatpush.msrb.mxu2 %v4497_v58  ;;  %v4625_v58 = vand.u32 4294901760, %v449_v52 }
  0xb7   : > { %1622 = vmatpush.msrb.mxu1 %v1621_v6  ;;  %1589 = vmatpush.msrb.mxu0 %v4475_v54  ;;  %v4676_v7 = vsub.f32 %v417_v43, %v4650_v36  ;;  %v291_v43 = vld [vmem:[%s4020_s9 + $0xd8] sm:$0xff] }
  0xb8   : > { %1689 = vmatpush.msrb.mxu3 %v4475_v54  ;;  %1595 = vmatmul.f32.vlgmr.msrb.gmra.mxu0 %v4113_v56 }
  0xb9   : > { %1628 = vmatpush.msrb.mxu1 %v1627_v9  ;;  %1666 = vmatmul.f32.vlgmr.msrb.gmra.mxu2 %v4070_v31 }
  0xba   : > { %1693 = vmatmul.f32.vlgmr.msrb.gmra.mxu3 %v4084_v38  ;;  %1768 = vmatpush.msra.mxu2 %v4477_v44 }
  0xbb   : > { %1712 = vmatpush.msra.mxu0 %v1613_v55  ;;  %1801 = vmatpush.msra.mxu3 %v1800_v13  ;;  %v2180_v13 = vand.u32 4294901760, %v4676_v7 }
  0xbc   : > { %1634 = vmatpush.msrb.mxu1 %v1633_v14  ;;  %1770 = vmatpush.msra.mxu2 %v4488_v49 }
  0xbd   : > { %1716 = vmatpush.msra.mxu0 %v1619_v60  ;;  %1807 = vmatpush.msra.mxu3 %v1806_v22  ;;  %v4623_v60 = vand.u32 4294901760, %v400_v50  ;;  %v2181_v23 = vsub.f32 %v4676_v7, %v2180_v13 }
  0xbe   : > { %1636 = vmatmul.f32.vlgmr.msrb.gmra.mxu1 %v4055_v20  ;;  %1772 = vmatpush.msra.mxu2 %v4502_v51 }
  0xbf   : > { %1743 = vmatpush.msra.mxu1 %v4439_v15  ;;  %1720 = vmatpush.msra.mxu0 %v1625_v62  ;;  %v305_v15 = vld [vmem:[%s4020_s9 + $0x148] sm:$0xff]  ;;  %v4632_v62 = vsub.f32 %v416_v19, %v4607_v41  ;;  %v354_v19 = vld [vmem:[%s4027_s11 + $0xd0] sm:$0xff] }
  0xc0   : > { %1813 = vmatpush.msra.mxu3 %v1812_v29  ;;  %1774 = vmatpush.msra.mxu2 %v4516_v0  ;;  %v433_v55 = vmul.f32 %v369_v32, %v305_v15  ;;  %v4735_v32 = vand.u32 4294901760, %v450_v18 }
  0xc1   : > { %1745 = vmatpush.msra.mxu1 %v4448_v42  ;;  %1724 = vmatpush.msra.mxu0 %v1631_v2  ;;  %v4605_v42 = vsub.f32 %v448_v12, %v4587_v27  ;;  %v4648_v2 = vsub.f32 %v449_v52, %v4625_v58  ;;  %v274_v52 = vld [vmem:[%s4020_s9 + $0x50] sm:$0xff] }
  0xc2   : > { %1819 = vmatpush.msra.mxu3 %v1818_v39  ;;  %1726 = vmatmul.f32.vlgmr.msra.gmra.mxu0 %v4055_v20  ;;  %v2182_v39 = vand.u32 4294901760, %v2181_v23 }
  0xc3   : > { %1747 = vmatpush.msra.mxu1 %v4459_v33  ;;  %1780 = vmatmul.f32.vlgmr.msra.gmra.mxu2 %v4113_v56  ;;  %v273_v33 = vld [vmem:[%s4020_s9 + $0x48] sm:$0xff] }
  0xc4   : > { %1821 = vmatmul.f32.vlgmr.msra.gmra.mxu3 %v4055_v20  ;;  %1897 = vmatpush.msrb.mxu2 %v1798_v1  ;;  %v401_v45 = vmul.f32 %v337_v26, %v273_v33  ;;  %v1989_v1 = vand.u32 4294901760, %v4617_v57  ;;  %v451_v33 = vmul.f32 %v387_v35, %v323_v34 }
  0xc5   : > { %1839 = vmatpush.msrb.mxu0 %v4500_v61  ;;  %1928 = vmatpush.msrb.mxu3 %v4477_v44  ;;  %v1983_v61 = vand.u32 4294901760, %v4605_v42 }
  0xc6   : > { %1749 = vmatpush.msra.mxu1 %v4475_v54  ;;  %1901 = vmatpush.msrb.mxu2 %v1804_v4  ;;  %v4636_v54 = vand.u32 4294901760, %v433_v55  ;;  %v4664_v4 = vand.u32 4294901760, %v401_v45 }
  0xc7   : > { %1842 = vmatpush.msrb.mxu0 %v4514_v63  ;;  %1930 = vmatpush.msrb.mxu3 %v4488_v49  ;;  %v4645_v63 = vsub.f32 %v400_v50, %v4623_v60  ;;  %v418_v50 = vmul.f32 %v354_v19, %v290_v24 }
  0xc8   : > { %1751 = vmatmul.f32.vlgmr.msra.gmra.mxu1 %v4055_v20  ;;  %1905 = vmatpush.msrb.mxu2 %v1810_v8  ;;  %v4662_v53 = vsub.f32 %v433_v55, %v4636_v54  ;;  %v4687_v9 = vsub.f32 %v401_v45, %v4664_v4  ;;  %v371_v55 = vld [vmem:[%s4027_s11 + $0x158] sm:$0xff] }
  0xc9   : > { %1868 = vmatpush.msrb.mxu1 %v4477_v44  ;;  %1845 = vmatpush.msrb.mxu0 %v4528_v3  ;;  %v1984_v44 = vsub.f32 %v4605_v42, %v1983_v61  ;;  %v1995_v3 = vand.u32 4294901760, %v4632_v62  ;;  %v2001_v6 = vand.u32 4294901760, %v4645_v63  ;;  %v4755_v26 = vand.u32 4294901760, %v418_v50 }
  0xca   : > { %1932 = vmatpush.msrb.mxu3 %v4502_v51  ;;  %1909 = vmatpush.msrb.mxu2 %v1816_v11  ;;  %v2174_v8 = vand.u32 4294901760, %v4662_v53  ;;  %v2186_v17 = vand.u32 4294901760, %v4687_v9 }
  0xcb   : > { %1870 = vmatpush.msrb.mxu1 %v4488_v49  ;;  %1848 = vmatpush.msrb.mxu0 %v4539_v5  ;;  %v1990_v49 = vsub.f32 %v4617_v57, %v1989_v1  ;;  %v2168_v5 = vand.u32 4294901760, %v4648_v2  ;;  %v1996_v59 = vsub.f32 %v4632_v62, %v1995_v3 }
  0xcc   : > { %1934 = vmatpush.msrb.mxu3 %v4516_v0  ;;  %1851 = vmatmul.f32.vlgmr.msrb.gmra.mxu0 %v4070_v31  ;;  %v2175_v16 = vsub.f32 %v4662_v53, %v2174_v8  ;;  %v2187_v29 = vsub.f32 %v4687_v9, %v2186_v17 }
  0xcd   : > { %1872 = vmatpush.msrb.mxu1 %v4502_v51  ;;  %1911 = vmatmul.f32.vlgmr.msrb.gmra.mxu2 %v4055_v20  ;;  %v1985_v51 = vand.u32 4294901760, %v1984_v44  ;;  %v1991_v10 = vand.u32 4294901760, %v1990_v49  ;;  %v2169_v11 = vsub.f32 %v4648_v2, %v2168_v5  ;;  %v1997_v14 = vand.u32 4294901760, %v1996_v59 }
  0xce   : > { %1936 = vmatmul.f32.vlgmr.msrb.gmra.mxu3 %v4055_v20  ;;  %2024 = vmatpush.msra.mxu2 %v4605_v42  ;;  %v2176_v12 = vand.u32 4294901760, %v2175_v16  ;;  %v2188_v47 = vand.u32 4294901760, %v2187_v29  ;;  %v338_v42 = vld [vmem:[%s4027_s11 + $0x50] sm:$0xff] }
  0xcf   : > { %1953 = vmatpush.msra.mxu0 %v4587_v27  ;;  %2053 = vmatpush.msra.mxu3 %v4587_v27  ;;  %v2170_v21 = vand.u32 4294901760, %v2169_v11 }
  0xd0   : > { %1874 = vmatpush.msrb.mxu1 %v4516_v0  ;;  %2027 = vmatpush.msra.mxu2 %v4617_v57  ;;  %v2002_v0 = vsub.f32 %v4645_v63, %v2001_v6  ;;  %v402_v57 = vmul.f32 %v338_v42, %v274_v52 }
  0xd1   : > { %1955 = vmatpush.msra.mxu0 %v4596_v48  ;;  %2055 = vmatpush.msra.mxu3 %v4596_v48 }
  0xd2   : > { %1878 = vmatmul.f32.vlgmr.msrb.gmra.mxu1 %v4084_v38  ;;  %2030 = vmatpush.msra.mxu2 %v4632_v62  ;;  %v2003_v22 = vand.u32 4294901760, %v2002_v0  ;;  %v4771_v49 = vand.u32 4294901760, %v402_v57 }
  0xd3   : > { %1986 = vmatpush.msra.mxu1 %v1985_v51  ;;  %1957 = vmatpush.msra.mxu0 %v4607_v41 }
  0xd4   : > { %2057 = vmatpush.msra.mxu3 %v4607_v41  ;;  %2033 = vmatpush.msra.mxu2 %v4645_v63  ;;  %v339_v63 = vld [vmem:[%s4027_s11 + $0x58] sm:$0xff] }
  0xd5   : > { %1992 = vmatpush.msra.mxu1 %v1991_v10  ;;  %1959 = vmatpush.msra.mxu0 %v4623_v60 }
  0xd6   : > { %2059 = vmatpush.msra.mxu3 %v4623_v60  ;;  %1965 = vmatmul.f32.vlgmr.msra.gmra.mxu0 %v4113_v56 }
  0xd7   : > { %1998 = vmatpush.msra.mxu1 %v1997_v14  ;;  %2036 = vmatmul.f32.vlgmr.msra.gmra.mxu2 %v4070_v31  ;;  %v4793_v14 = vsub.f32 %v402_v57, %v4771_v49  ;;  %v324_v57 = vld [vmem:[%s4020_s9 + $0x1e0] sm:$0xff] }
  0xd8   : > { %2063 = vmatmul.f32.vlgmr.msra.gmra.mxu3 %v4084_v38  ;;  %2138 = vmatpush.msrb.mxu2 %v4625_v58 }
  0xd9   : > { %2082 = vmatpush.msrb.mxu0 %v1983_v61  ;;  %2171 = vmatpush.msrb.mxu3 %v2170_v21  ;;  %v355_v61 = vld [vmem:[%s4027_s11 + $0xd8] sm:$0xff]  ;;  %v2371_v25 = vand.u32 4294901760, %v4793_v14 }
  0xda   : > { %2004 = vmatpush.msra.mxu1 %v2003_v22  ;;  %2140 = vmatpush.msrb.mxu2 %v4636_v54  ;;  %v419_v51 = vmul.f32 %v355_v61, %v291_v43 }
  0xdb   : > { %2086 = vmatpush.msrb.mxu0 %v1989_v1  ;;  %2177 = vmatpush.msrb.mxu3 %v2176_v12  ;;  %v275_v1 = vld [vmem:[%s4020_s9 + $0x58] sm:$0xff] }
  0xdc   : > { %2006 = vmatmul.f32.vlgmr.msra.gmra.mxu1 %v4055_v20  ;;  %2142 = vmatpush.msrb.mxu2 %v4650_v36  ;;  %v403_v11 = vmul.f32 %v339_v63, %v275_v1  ;;  %v4798_v21 = vand.u32 4294901760, %v419_v51  ;;  %v372_v1 = vld [vmem:[%s4027_s11 + $0x160] sm:$0xff] }
  0xdd   : > { %2113 = vmatpush.msrb.mxu1 %v4587_v27  ;;  %2090 = vmatpush.msrb.mxu0 %v1995_v3  ;;  %v307_v27 = vld [vmem:[%s4020_s9 + $0x158] sm:$0xff] }
  0xde   : > { %2183 = vmatpush.msrb.mxu3 %v2182_v39  ;;  %2144 = vmatpush.msrb.mxu2 %v4664_v4  ;;  %v435_v62 = vmul.f32 %v371_v55, %v307_v27  ;;  %v4812_v23 = vand.u32 4294901760, %v403_v11  ;;  %v4824_v28 = vsub.f32 %v419_v51, %v4798_v21 }
  0xdf   : > { %2115 = vmatpush.msrb.mxu1 %v4596_v48  ;;  %2094 = vmatpush.msrb.mxu0 %v2001_v6  ;;  %v4753_v48 = vsub.f32 %v450_v18, %v4735_v32  ;;  %v4773_v6 = vand.u32 4294901760, %v451_v33 }
  0xe0   : > { %v486_v15 = vpop.f32.mrf.mxu0  ;;  %2189 = vmatpush.msrb.mxu3 %v2188_v47  ;;  %2096 = vmatmul.f32.vlgmr.msrb.gmra.mxu0 %v4055_v20  ;;  %v4837_v18 = vsub.f32 %v403_v11, %v4812_v23  ;;  %v2550_v47 = vand.u32 4294901760, %v4824_v28  ;;  %v356_v11 = vld [vmem:[%s4027_s11 + $0xe0] sm:$0xff] }
  0xe1   : > { %2117 = vmatpush.msrb.mxu1 %v4607_v41  ;;  %2150 = vmatmul.f32.vlgmr.msrb.gmra.mxu2 %v4113_v56  ;;  %v4765_v41 = vsub.f32 %v434_v40, %v4744_v46  ;;  %v557_v3 = vpop.f32.mrf.mxu2  ;;  %v4796_v16 = vsub.f32 %v451_v33, %v4773_v6  ;;  %v2372_v40 = vsub.f32 %v4793_v14, %v2371_v25  ;;  %v388_v33 = vld [vmem:[%s4027_s11 + $0x1e0] sm:$0xff] }
  0xe2   : > { %2191 = vmatmul.f32.vlgmr.msrb.gmra.mxu3 %v4055_v20  ;;  %v527_v45 = vpop.f32.mrf.mxu1  ;;  %2267 = vmatpush.msra.mxu2 %v2168_v5  ;;  %v584_v59 = vpop.f32.mrf.mxu3  ;;  %v4780_v5 = vsub.f32 %v418_v50, %v4755_v26  ;;  %v2556_v42 = vand.u32 4294901760, %v4837_v18  ;;  %v2551_v55 = vsub.f32 %v4824_v28, %v2550_v47 }
  0xe3   : > { %2209 = vmatpush.msra.mxu0 %v4648_v2  ;;  %v528_v44 = vadd.f32 %v527_v45, %v486_v15  ;;  %2298 = vmatpush.msra.mxu3 %v4625_v58  ;;  %v2353_v2 = vand.u32 4294901760, %v4753_v48  ;;  %v2373_v27 = vand.u32 4294901760, %v2372_v40  ;;  %v308_v45 = vld [vmem:[%s4020_s9 + $0x160] sm:$0xff] }
  0xe4   : > { %2119 = vmatpush.msrb.mxu1 %v4623_v60  ;;  %2271 = vmatpush.msra.mxu2 %v2174_v8  ;;  %v4784_v60 = vand.u32 4294901760, %v435_v62 }
  0xe5   : > { %2212 = vmatpush.msra.mxu0 %v4662_v53  ;;  %v558_v10 = vadd.f32 %v557_v3, %v528_v44  ;;  %2300 = vmatpush.msra.mxu3 %v4636_v54  ;;  %v2359_v53 = vand.u32 4294901760, %v4765_v41  ;;  %v452_v44 = vmul.f32 %v388_v33, %v324_v57 }
  0xe6   : > { %2121 = vmatmul.f32.vlgmr.msrb.gmra.mxu1 %v4055_v20  ;;  %2275 = vmatpush.msra.mxu2 %v2180_v13  ;;  %v4810_v22 = vsub.f32 %v435_v62, %v4784_v60  ;;  %v2557_v62 = vsub.f32 %v4837_v18, %v2556_v42 }
  0xe7   : > { %2238 = vmatpush.msra.mxu1 %v4625_v58  ;;  %v585_v8 = vadd.f32 %v584_v59, %v558_v10  ;;  %2215 = vmatpush.msra.mxu0 %v4676_v7  ;;  %v2354_v58 = vsub.f32 %v4753_v48, %v2353_v2  ;;  %v2365_v7 = vand.u32 4294901760, %v4780_v5  ;;  %v2552_v59 = vand.u32 4294901760, %v2551_v55  ;;  %v292_v10 = vld [vmem:[%s4020_s9 + $0xe0] sm:$0xff] }
  0xe8   : > { %v617_v0 = vpop.f32.mrf.mxu0  ;;  %2302 = vmatpush.msra.mxu3 %v4650_v36  ;;  %2279 = vmatpush.msra.mxu2 %v2186_v17  ;;  %v2544_v37 = vand.u32 4294901760, %v4810_v22 }
  0xe9   : > { %2240 = vmatpush.msra.mxu1 %v4636_v54  ;;  %v618_v13 = vadd.f32 %v617_v0, %v585_v8  ;;  %2218 = vmatpush.msra.mxu0 %v4687_v9  ;;  %v2360_v54 = vsub.f32 %v4765_v41, %v2359_v53  ;;  %v2538_v9 = vand.u32 4294901760, %v4796_v16  ;;  %v2366_v29 = vsub.f32 %v4780_v5, %v2365_v7  ;;  %v325_v8 = vld [vmem:[%s4020_s9 + $0x1e8] sm:$0xff] }
  0xea   : > { %2304 = vmatpush.msra.mxu3 %v4664_v4  ;;  %2221 = vmatmul.f32.vlgmr.msra.gmra.mxu0 %v4070_v31  ;;  %v671_v30 = vpop.f32.mrf.mxu2  ;;  %v2545_v52 = vsub.f32 %v4810_v22, %v2544_v37 }
  0xeb   : > { %2242 = vmatpush.msra.mxu1 %v4650_v36  ;;  %v642_v17 = vpop.f32.mrf.mxu1  ;;  %2281 = vmatmul.f32.vlgmr.msra.gmra.mxu2 %v4055_v20  ;;  %v2355_v36 = vand.u32 4294901760, %v2354_v58  ;;  %v2361_v24 = vand.u32 4294901760, %v2360_v54  ;;  %v2367_v15 = vand.u32 4294901760, %v2366_v29  ;;  %v4887_v54 = vand.u32 4294901760, %v452_v44 }
  0xec   : > { %2306 = vmatmul.f32.vlgmr.msra.gmra.mxu3 %v4055_v20  ;;  %v4826_v12 = vadd.f32 %v642_v17, %v618_v13  ;;  %2394 = vmatpush.msrb.mxu2 %v4753_v48  ;;  %v712_v39 = vpop.f32.mrf.mxu3  ;;  %v2546_v61 = vand.u32 4294901760, %v2545_v52  ;;  %v436_v48 = vmul.f32 %v372_v1, %v308_v45  ;;  %v420_v17 = vmul.f32 %v356_v11, %v292_v10 }
  0xed   : > { %2323 = vmatpush.msrb.mxu0 %v4735_v32  ;;  %2423 = vmatpush.msrb.mxu3 %v4735_v32  ;;  %v713_v19 = vadd.f32 %v712_v39, %v671_v30  ;;  %v309_v30 = vld [vmem:[%s4020_s9 + $0x168] sm:$0xff] }
  0xee   : > { %2244 = vmatpush.msra.mxu1 %v4664_v4  ;;  %2397 = vmatpush.msrb.mxu2 %v4765_v41  ;;  %v2539_v4 = vsub.f32 %v4796_v16, %v2538_v9  ;;  %v276_v41 = vld [vmem:[%s4020_s9 + $0x60] sm:$0xff]  ;;  %v373_v39 = vld [vmem:[%s4027_s11 + $0x168] sm:$0xff] }
  0xef   : > { %2325 = vmatpush.msrb.mxu0 %v4744_v46  ;;  %2425 = vmatpush.msrb.mxu3 %v4744_v46  ;;  %v437_v40 = vmul.f32 %v373_v39, %v309_v30 }
  0xf0   : > { %2248 = vmatmul.f32.vlgmr.msra.gmra.mxu1 %v4084_v38  ;;  %v742_v34 = vpop.f32.mrf.mxu0  ;;  %2400 = vmatpush.msrb.mxu2 %v4780_v5  ;;  %v2540_v35 = vand.u32 4294901760, %v2539_v4 }
  0xf1   : > { %2356 = vmatpush.msrb.mxu1 %v2355_v36  ;;  %v743_v50 = vadd.f32 %v742_v34, %v713_v19  ;;  %2327 = vmatpush.msrb.mxu0 %v4755_v26  ;;  %v389_v36 = vld [vmem:[%s4027_s11 + $0x1e8] sm:$0xff]  ;;  %v4911_v19 = vand.u32 4294901760, %v420_v17 }
  0xf2   : > { %2427 = vmatpush.msrb.mxu3 %v4755_v26  ;;  %2403 = vmatpush.msrb.mxu2 %v4793_v14  ;;  %v453_v5 = vmul.f32 %v389_v36, %v325_v8  ;;  %v293_v14 = vld [vmem:[%s4020_s9 + $0xe8] sm:$0xff]  ;;  %v390_v36 = vld [vmem:[%s4027_s11 + $0x1f0] sm:$0xff] }
  0xf3   : > { %2362 = vmatpush.msrb.mxu1 %v2361_v24  ;;  %2329 = vmatpush.msrb.mxu0 %v4771_v49  ;;  %v341_v34 = vld [vmem:[%s4027_s11 + $0x68] sm:$0xff] }
  0xf4   : > { %2429 = vmatpush.msrb.mxu3 %v4771_v49  ;;  %2335 = vmatmul.f32.vlgmr.msrb.gmra.mxu0 %v4113_v56 }
  0xf5   : > { %2368 = vmatpush.msrb.mxu1 %v2367_v15  ;;  %v769_v43 = vpop.f32.mrf.mxu1  ;;  %2406 = vmatmul.f32.vlgmr.msrb.gmra.mxu2 %v4070_v31  ;;  %v802_v3 = vpop.f32.mrf.mxu2 }
  0xf6   : > { %2433 = vmatmul.f32.vlgmr.msrb.gmra.mxu3 %v4084_v38  ;;  %v770_v63 = vadd.f32 %v769_v43, %v743_v50  ;;  %2508 = vmatpush.msra.mxu2 %v4773_v6 }
  0xf7   : > { %2452 = vmatpush.msra.mxu0 %v2353_v2  ;;  %v827_v51 = vpop.f32.mrf.mxu3  ;;  %2541 = vmatpush.msra.mxu3 %v2540_v35  ;;  %v2558_v2 = vand.u32 4294901760, %v2557_v62  ;;  %v4935_v35 = vand.u32 4294901760, %v453_v5 }
  0xf8   : > { %2374 = vmatpush.msrb.mxu1 %v2373_v27  ;;  %v803_v0 = vadd.f32 %v802_v3, %v770_v63  ;;  %2510 = vmatpush.msra.mxu2 %v4784_v60  ;;  %v4942_v27 = vsub.f32 %v420_v17, %v4911_v19 }
  0xf9   : > { %2456 = vmatpush.msra.mxu0 %v2359_v53  ;;  %2547 = vmatpush.msra.mxu3 %v2546_v61  ;;  %v4883_v13 = vpop.f32.mrf.mxu0  ;;  %v340_v53 = vld [vmem:[%s4027_s11 + $0x60] sm:$0xff]  ;;  %v4960_v33 = vsub.f32 %v453_v5, %v4935_v35  ;;  %v374_v5 = vld [vmem:[%s4027_s11 + $0x170] sm:$0xff] }
  0xfa   : > { %2376 = vmatmul.f32.vlgmr.msrb.gmra.mxu1 %v4055_v20  ;;  %v828_v58 = vadd.f32 %v827_v51, %v803_v0  ;;  %2512 = vmatpush.msra.mxu2 %v4798_v21  ;;  %v404_v24 = vmul.f32 %v340_v53, %v276_v41  ;;  %v326_v53 = vld [vmem:[%s4020_s9 + $0x1f0] sm:$0xff] }
  0xfb   : > { %2483 = vmatpush.msra.mxu1 %v4735_v32  ;;  %2460 = vmatpush.msra.mxu0 %v2365_v7  ;;  %v4896_v32 = vand.u32 4294901760, %v436_v48 }
  0xfc   : > { %2553 = vmatpush.msra.mxu3 %v2552_v59  ;;  %v3436_v29 = vrot.slane %v828_v58, 7  ;;  %2514 = vmatpush.msra.mxu2 %v4812_v23  ;;  %v4933_v52 = vand.u32 4294901760, %v404_v24 }
  0xfd   : > { %2485 = vmatpush.msra.mxu1 %v4744_v46  ;;  %2464 = vmatpush.msra.mxu0 %v2371_v25  ;;  %v4909_v46 = vsub.f32 %v452_v44, %v4887_v54  ;;  %v357_v25 = vld [vmem:[%s4027_s11 + $0xe8] sm:$0xff] }
  0xfe   : > { %2559 = vmatpush.msra.mxu3 %v2558_v2  ;;  %v4904_v7 = vsel %vm3450_vm1, %v4826_v12, %v3436_v29  ;;  %2466 = vmatmul.f32.vlgmr.msra.gmra.mxu0 %v4055_v20  ;;  %v277_v12 = vld [vmem:[%s4020_s9 + $0x68] sm:$0xff] }
  0xff   : > { %2487 = vmatpush.msra.mxu1 %v4755_v26  ;;  %v4915_v4 = vpop.f32.mrf.mxu1  ;;  %2520 = vmatmul.f32.vlgmr.msra.gmra.mxu2 %v4113_v56  ;;  %v4923_v26 = vsub.f32 %v436_v48, %v4896_v32  ;;  %v405_v55 = vmul.f32 %v341_v34, %v277_v12  ;;  %v294_v34 = vld [vmem:[%s4020_s9 + $0xf0] sm:$0xff] }
 0x100   : > { %2561 = vmatmul.f32.vlgmr.msra.gmra.mxu3 %v4055_v20  ;;  %2637 = vmatpush.msrb.mxu2 %v2538_v9  ;;  %v4927_v15 = vpop.f32.mrf.mxu2  ;;  %v421_v9 = vmul.f32 %v357_v25, %v293_v14  ;;  %v454_v14 = vmul.f32 %v390_v36, %v326_v53 }
 0x101   : > { %2579 = vmatpush.msrb.mxu0 %v4796_v16  ;;  %v4929_v50 = vpop.f32.mrf.mxu3  ;;  %2668 = vmatpush.msrb.mxu3 %v4773_v6  ;;  %v2723_v16 = vand.u32 4294901760, %v4909_v46  ;;  %v4976_v61 = vand.u32 4294901760, %v405_v55 }
 0x102   : > { %2489 = vmatpush.msra.mxu1 %v4771_v49  ;;  %2641 = vmatpush.msrb.mxu2 %v2544_v37  ;;  %v4946_v49 = vand.u32 4294901760, %v437_v40  ;;  %v4957_v37 = vsub.f32 %v404_v24, %v4933_v52  ;;  %v4962_v43 = vand.u32 4294901760, %v421_v9  ;;  %v310_v24 = vld [vmem:[%s4020_s9 + $0x170] sm:$0xff] }
 0x103   : > { %2582 = vmatpush.msrb.mxu0 %v4810_v22  ;;  %2670 = vmatpush.msrb.mxu3 %v4784_v60  ;;  %v4948_v57 = vpop.f32.mrf.mxu0  ;;  %v2729_v22 = vand.u32 4294901760, %v4923_v26  ;;  %v5005_v51 = vsub.f32 %v405_v55, %v4976_v61  ;;  %v327_v55 = vld [vmem:[%s4020_s9 + $0x1f8] sm:$0xff] }
 0x104   : > { %2491 = vmatmul.f32.vlgmr.msra.gmra.mxu1 %v4055_v20  ;;  %2645 = vmatpush.msrb.mxu2 %v2550_v47  ;;  %v4974_v47 = vsub.f32 %v437_v40, %v4946_v49  ;;  %v2741_v62 = vand.u32 4294901760, %v4957_v37  ;;  %v4990_v45 = vsub.f32 %v421_v9, %v4962_v43  ;;  %v358_v9 = vld [vmem:[%s4027_s11 + $0xf0] sm:$0xff] }
 0x105   : > { %2608 = vmatpush.msrb.mxu1 %v4773_v6  ;;  %2585 = vmatpush.msrb.mxu0 %v4824_v28  ;;  %v2724_v6 = vsub.f32 %v4909_v46, %v2723_v16  ;;  %v2735_v28 = vand.u32 4294901760, %v4942_v27  ;;  %v2926_v8 = vand.u32 4294901760, %v5005_v51 }
 0x106   : > { %2672 = vmatpush.msrb.mxu3 %v4798_v21  ;;  %2649 = vmatpush.msrb.mxu2 %v2556_v42  ;;  %v2914_v3 = vand.u32 4294901760, %v4974_v47  ;;  %v2920_v11 = vand.u32 4294901760, %v4990_v45 }
 0x107   : > { %2610 = vmatpush.msrb.mxu1 %v4784_v60  ;;  %2588 = vmatpush.msrb.mxu0 %v4837_v18  ;;  %v2730_v60 = vsub.f32 %v4923_v26, %v2729_v22  ;;  %v2908_v18 = vand.u32 4294901760, %v4960_v33  ;;  %v2736_v1 = vsub.f32 %v4942_v27, %v2735_v28  ;;  %v2927_v39 = vsub.f32 %v5005_v51, %v2926_v8 }
 0x108   : > { %2674 = vmatpush.msrb.mxu3 %v4812_v23  ;;  %2591 = vmatmul.f32.vlgmr.msrb.gmra.mxu0 %v4070_v31  ;;  %v2915_v2 = vsub.f32 %v4974_v47, %v2914_v3  ;;  %v2921_v41 = vsub.f32 %v4990_v45, %v2920_v11 }
 0x109   : > { %2612 = vmatpush.msrb.mxu1 %v4798_v21  ;;  %v4983_v42 = vpop.f32.mrf.mxu1  ;;  %2651 = vmatmul.f32.vlgmr.msrb.gmra.mxu2 %v4055_v20  ;;  %v2725_v21 = vand.u32 4294901760, %v2724_v6  ;;  %v2731_v59 = vand.u32 4294901760, %v2730_v60  ;;  %v2909_v10 = vsub.f32 %v4960_v33, %v2908_v18  ;;  %v2737_v48 = vand.u32 4294901760, %v2736_v1  ;;  %v278_v1 = vld [vmem:[%s4020_s9 + $0x70] sm:$0xff] }
 0x10a   : > { %2676 = vmatmul.f32.vlgmr.msrb.gmra.mxu3 %v4055_v20  ;;  %2764 = vmatpush.msra.mxu2 %v4909_v46  ;;  %v4997_v63 = vpop.f32.mrf.mxu2  ;;  %v2916_v30 = vand.u32 4294901760, %v2915_v2  ;;  %v2922_v12 = vand.u32 4294901760, %v2921_v41  ;;  %v438_v46 = vmul.f32 %v374_v5, %v310_v24  ;;  %v5063_v60 = vand.u32 4294901760, %v454_v14  ;;  %v359_v2 = vld [vmem:[%s4027_s11 + $0xf8] sm:$0xff] }
 0x10b   : > { %2693 = vmatpush.msra.mxu0 %v4887_v54  ;;  %v4999_v44 = vpop.f32.mrf.mxu3  ;;  %2793 = vmatpush.msra.mxu3 %v4887_v54  ;;  %v2910_v58 = vand.u32 4294901760, %v2909_v10  ;;  %v375_v10 = vld [vmem:[%s4027_s11 + $0x178] sm:$0xff] }
 0x10c   : > { %2614 = vmatpush.msrb.mxu1 %v4812_v23  ;;  %2767 = vmatpush.msra.mxu2 %v4923_v26  ;;  %v2742_v23 = vsub.f32 %v4957_v37, %v2741_v62  ;;  %v342_v26 = vld [vmem:[%s4027_s11 + $0x70] sm:$0xff] }
 0x10d   : > { %2695 = vmatpush.msra.mxu0 %v4896_v32  ;;  %2795 = vmatpush.msra.mxu3 %v4896_v32  ;;  %v5018_v0 = vpop.f32.mrf.mxu0 }
 0x10e   : > { %2618 = vmatmul.f32.vlgmr.msrb.gmra.mxu1 %v4084_v38  ;;  %2770 = vmatpush.msra.mxu2 %v4942_v27  ;;  %v2743_v17 = vand.u32 4294901760, %v2742_v23  ;;  %v406_v23 = vmul.f32 %v342_v26, %v278_v1 }
 0x10f   : > { %2726 = vmatpush.msra.mxu1 %v2725_v21  ;;  %2697 = vmatpush.msra.mxu0 %v4911_v19  ;;  %v422_v21 = vmul.f32 %v358_v9, %v294_v34 }
 0x110   : > { %2797 = vmatpush.msra.mxu3 %v4911_v19  ;;  %2773 = vmatpush.msra.mxu2 %v4957_v37  ;;  %v5105_v36 = vand.u32 4294901760, %v406_v23 }
 0x111   : > { %2732 = vmatpush.msra.mxu1 %v2731_v59  ;;  %2699 = vmatpush.msra.mxu0 %v4933_v52  ;;  %v5072_v59 = vand.u32 4294901760, %v438_v46 }
 0x112   : > { %2799 = vmatpush.msra.mxu3 %v4933_v52  ;;  %2705 = vmatmul.f32.vlgmr.msra.gmra.mxu0 %v4113_v56 }
 0x113   : > { %2738 = vmatpush.msra.mxu1 %v2737_v48  ;;  %v5036_v29 = vpop.f32.mrf.mxu1  ;;  %2776 = vmatmul.f32.vlgmr.msra.gmra.mxu2 %v4070_v31  ;;  %v295_v48 = vld [vmem:[%s4020_s9 + $0xf8] sm:$0xff] }
 0x114   : > { %2803 = vmatmul.f32.vlgmr.msra.gmra.mxu3 %v4084_v38  ;;  %2878 = vmatpush.msrb.mxu2 %v4935_v35  ;;  %v5048_v25 = vpop.f32.mrf.mxu2 }
 0x115   : > { %2822 = vmatpush.msrb.mxu0 %v2723_v16  ;;  %v5050_v40 = vpop.f32.mrf.mxu3  ;;  %2911 = vmatpush.msrb.mxu3 %v2910_v58  ;;  %v2928_v16 = vand.u32 4294901760, %v2927_v39 }
 0x116   : > { %2744 = vmatpush.msra.mxu1 %v2743_v17  ;;  %2880 = vmatpush.msrb.mxu2 %v4946_v49  ;;  %v343_v17 = vld [vmem:[%s4027_s11 + $0x78] sm:$0xff] }
 0x117   : > { %2826 = vmatpush.msrb.mxu0 %v2729_v22  ;;  %2917 = vmatpush.msrb.mxu3 %v2916_v30  ;;  %v5059_v6 = vpop.f32.mrf.mxu0  ;;  %v391_v22 = vld [vmem:[%s4027_s11 + $0x1f8] sm:$0xff] }
 0x118   : > { %2746 = vmatmul.f32.vlgmr.msra.gmra.mxu1 %v4055_v20  ;;  %2882 = vmatpush.msrb.mxu2 %v4962_v43  ;;  %v455_v27 = vmul.f32 %v391_v22, %v327_v55 }
 0x119   : > { %2853 = vmatpush.msrb.mxu1 %v4887_v54  ;;  %2830 = vmatpush.msrb.mxu0 %v2735_v28  ;;  %v311_v54 = vld [vmem:[%s4020_s9 + $0x178] sm:$0xff]  ;;  %v5083_v28 = vand.u32 4294901760, %v422_v21 }
 0x11a   : > { %2923 = vmatpush.msrb.mxu3 %v2922_v12  ;;  %2884 = vmatpush.msrb.mxu2 %v4976_v61  ;;  %v439_v37 = vmul.f32 %v375_v10, %v311_v54  ;;  %v5107_v30 = vand.u32 4294901760, %v455_v27 }
 0x11b   : > { %2855 = vmatpush.msrb.mxu1 %v4896_v32  ;;  %2834 = vmatpush.msrb.mxu0 %v2741_v62  ;;  %v5081_v32 = vsub.f32 %v454_v14, %v5063_v60  ;;  %v279_v62 = vld [vmem:[%s4020_s9 + $0x78] sm:$0xff]  ;;  %v5114_v39 = vsub.f32 %v422_v21, %v5083_v28 }
 0x11c   : > { %2929 = vmatpush.msrb.mxu3 %v2928_v16  ;;  %2836 = vmatmul.f32.vlgmr.msrb.gmra.mxu0 %v4055_v20  ;;  %v407_v24 = vmul.f32 %v343_v17, %v279_v62  ;;  %v5132_v14 = vsub.f32 %v455_v27, %v5107_v30 }
 0x11d   : > { %2857 = vmatpush.msrb.mxu1 %v4911_v19  ;;  %v5087_v58 = vpop.f32.mrf.mxu1  ;;  %2890 = vmatmul.f32.vlgmr.msrb.gmra.mxu2 %v4113_v56  ;;  %v5095_v19 = vsub.f32 %v438_v46, %v5072_v59 }
 0x11e   : > { %2931 = vmatmul.f32.vlgmr.msrb.gmra.mxu3 %v4055_v20  ;;  %3007 = vmatpush.msra.mxu2 %v2908_v18  ;;  %v5099_v41 = vpop.f32.mrf.mxu2  ;;  %v423_v18 = vmul.f32 %v359_v2, %v295_v48  ;;  %v5148_v34 = vand.u32 4294901760, %v407_v24 }
 0x11f   : > { %2949 = vmatpush.msra.mxu0 %v4960_v33  ;;  %v5101_v53 = vpop.f32.mrf.mxu3  ;;  %3038 = vmatpush.msra.mxu3 %v4935_v35  ;;  %v3093_v33 = vand.u32 4294901760, %v5081_v32 }
 0x120   : > { %2859 = vmatpush.msrb.mxu1 %v4933_v52  ;;  %3011 = vmatpush.msra.mxu2 %v2914_v3  ;;  %v5118_v52 = vand.u32 4294901760, %v439_v37  ;;  %v5129_v3 = vsub.f32 %v406_v23, %v5105_v36  ;;  %v5134_v12 = vand.u32 4294901760, %v423_v18  ;;  %v5177_v26 = vsub.f32 %v407_v24, %v5148_v34 }
 0x121   : > { %2952 = vmatpush.msra.mxu0 %v4974_v47  ;;  %3040 = vmatpush.msra.mxu3 %v4946_v49  ;;  %v5120_v5 = vpop.f32.mrf.mxu0  ;;  %v3099_v47 = vand.u32 4294901760, %v5095_v19 }
 0x122   : > { %2861 = vmatmul.f32.vlgmr.msrb.gmra.mxu1 %v4055_v20  ;;  %3015 = vmatpush.msra.mxu2 %v2920_v11  ;;  %v5146_v11 = vsub.f32 %v439_v37, %v5118_v52  ;;  %v3111_v9 = vand.u32 4294901760, %v5129_v3  ;;  %v5162_v46 = vsub.f32 %v423_v18, %v5134_v12  ;;  %v3296_v2 = vand.u32 4294901760, %v5177_v26 }
 0x123   : > { %2978 = vmatpush.msra.mxu1 %v4935_v35  ;;  %2955 = vmatpush.msra.mxu0 %v4990_v45  ;;  %v3094_v35 = vsub.f32 %v5081_v32, %v3093_v33  ;;  %v3105_v45 = vand.u32 4294901760, %v5114_v39 }
 0x124   : > { %3042 = vmatpush.msra.mxu3 %v4962_v43  ;;  %3019 = vmatpush.msra.mxu2 %v2926_v8  ;;  %v3284_v1 = vand.u32 4294901760, %v5146_v11  ;;  %v3290_v10 = vand.u32 4294901760, %v5162_v46 }
 0x125   : > { %2980 = vmatpush.msra.mxu1 %v4946_v49  ;;  %2958 = vmatpush.msra.mxu0 %v5005_v51  ;;  %v3100_v49 = vsub.f32 %v5095_v19, %v3099_v47  ;;  %v3278_v51 = vand.u32 4294901760, %v5132_v14  ;;  %v3106_v16 = vsub.f32 %v5114_v39, %v3105_v45 }
 0x126   : > { %3044 = vmatpush.msra.mxu3 %v4976_v61  ;;  %2961 = vmatmul.f32.vlgmr.msra.gmra.mxu0 %v4070_v31  ;;  %v3285_v48 = vsub.f32 %v5146_v11, %v3284_v1  ;;  %v3291_v17 = vsub.f32 %v5162_v46, %v3290_v10 }
 0x127   : > { %2982 = vmatpush.msra.mxu1 %v4962_v43  ;;  %v5155_v8 = vpop.f32.mrf.mxu1  ;;  %3021 = vmatmul.f32.vlgmr.msra.gmra.mxu2 %v4055_v20  ;;  %v3095_v43 = vand.u32 4294901760, %v3094_v35  ;;  %v3101_v22 = vand.u32 4294901760, %v3100_v49  ;;  %v3279_v54 = vsub.f32 %v5132_v14, %v3278_v51  ;;  %v3107_v27 = vand.u32 4294901760, %v3106_v16 }
 0x128   : > { %3046 = vmatmul.f32.vlgmr.msra.gmra.mxu3 %v4055_v20  ;;  %3134 = vmatpush.msrb.mxu2 %v5081_v32  ;;  %v5169_v55 = vpop.f32.mrf.mxu2  ;;  %v3286_v24 = vand.u32 4294901760, %v3285_v48 }
 0x129   : > { %3063 = vmatpush.msrb.mxu0 %v5063_v60  ;;  %v5171_v21 = vpop.f32.mrf.mxu3  ;;  %3163 = vmatpush.msrb.mxu3 %v5063_v60  ;;  %v3280_v37 = vand.u32 4294901760, %v3279_v54 }
 0x12a   : > { %2984 = vmatpush.msra.mxu1 %v4976_v61  ;;  %3137 = vmatpush.msrb.mxu2 %v5095_v19  ;;  %v3112_v61 = vsub.f32 %v5129_v3, %v3111_v9  ;;  %v898_v19 = vadd.f32 %v4915_v4, %v4883_v13  ;;  %v1453_v13 = vadd.f32 %v5171_v21, %v5169_v55 }
 0x12b   : > { %3065 = vmatpush.msrb.mxu0 %v5072_v59  ;;  %3165 = vmatpush.msrb.mxu3 %v5072_v59  ;;  %v5188_v23 = vpop.f32.mrf.mxu0 }
 0x12c   : > { %2988 = vmatmul.f32.vlgmr.msra.gmra.mxu1 %v4084_v38  ;;  %3140 = vmatpush.msrb.mxu2 %v5114_v39  ;;  %v3113_v62 = vand.u32 4294901760, %v3112_v61 }
 0x12d   : > { %3096 = vmatpush.msrb.mxu1 %v3095_v43  ;;  %3067 = vmatpush.msrb.mxu0 %v5083_v28  ;;  %v3292_v43 = vand.u32 4294901760, %v3291_v17 }
 0x12e   : > { %3167 = vmatpush.msrb.mxu3 %v5083_v28  ;;  %3143 = vmatpush.msrb.mxu2 %v5129_v3  ;;  %v3297_v3 = vsub.f32 %v5177_v26, %v3296_v2 }
 0x12f   : > { %3102 = vmatpush.msrb.mxu1 %v3101_v22  ;;  %3069 = vmatpush.msrb.mxu0 %v5105_v36 }
 0x130   : > { %3169 = vmatpush.msrb.mxu3 %v5105_v36  ;;  %3075 = vmatmul.f32.vlgmr.msrb.gmra.mxu0 %v4113_v56  ;;  %v3298_v16 = vand.u32 4294901760, %v3297_v3 }
 0x131   : > { %3108 = vmatpush.msrb.mxu1 %v3107_v27  ;;  %v5202_v18 = vpop.f32.mrf.mxu1  ;;  %3146 = vmatmul.f32.vlgmr.msrb.gmra.mxu2 %v4070_v31 }
 0x132   : > { %3173 = vmatmul.f32.vlgmr.msrb.gmra.mxu3 %v4084_v38  ;;  %3248 = vmatpush.msra.mxu2 %v5107_v30  ;;  %v5212_v35 = vpop.f32.mrf.mxu2 }
 0x133   : > { %3192 = vmatpush.msra.mxu0 %v3093_v33  ;;  %v5214_v49 = vpop.f32.mrf.mxu3  ;;  %3281 = vmatpush.msra.mxu3 %v3280_v37 }
 0x134   : > { %3114 = vmatpush.msrb.mxu1 %v3113_v62  ;;  %3250 = vmatpush.msra.mxu2 %v5118_v52 }
 0x135   : > { %3196 = vmatpush.msra.mxu0 %v3099_v47  ;;  %3287 = vmatpush.msra.mxu3 %v3286_v24  ;;  %v1596_v22 = vpop.f32.mrf.mxu0 }
 0x136   : > { %3116 = vmatmul.f32.vlgmr.msrb.gmra.mxu1 %v4055_v20  ;;  %3252 = vmatpush.msra.mxu2 %v5134_v12 }
 0x137   : > { %3223 = vmatpush.msra.mxu1 %v5063_v60  ;;  %3200 = vmatpush.msra.mxu0 %v3105_v45 }
 0x138   : > { %3293 = vmatpush.msra.mxu3 %v3292_v43  ;;  %3254 = vmatpush.msra.mxu2 %v5148_v34 }
 0x139   : > { %3225 = vmatpush.msra.mxu1 %v5072_v59  ;;  %3204 = vmatpush.msra.mxu0 %v3111_v9 }
 0x13a   : > { %3299 = vmatpush.msra.mxu3 %v3298_v16  ;;  %3206 = vmatmul.f32.vlgmr.msra.gmra.mxu0 %v4055_v20 }
 0x13b   : > { %3227 = vmatpush.msra.mxu1 %v5083_v28  ;;  %v1637_v32 = vpop.f32.mrf.mxu1  ;;  %3260 = vmatmul.f32.vlgmr.msra.gmra.mxu2 %v4113_v56  ;;  %v1083_v28 = vadd.f32 %v4999_v44, %v4997_v63  ;;  %v928_v63 = vadd.f32 %v4927_v15, %v898_v19 }
 0x13c   : > { %3301 = vmatmul.f32.vlgmr.msra.gmra.mxu3 %v4055_v20  ;;  %3377 = vmatpush.msrb.mxu2 %v3278_v51  ;;  %v1667_v60 = vpop.f32.mrf.mxu2  ;;  %v1638_v4 = vadd.f32 %v1637_v32, %v1596_v22 }
 0x13d   : > { %3319 = vmatpush.msrb.mxu0 %v5132_v14  ;;  %v1694_v59 = vpop.f32.mrf.mxu3  ;;  %3229 = vmatpush.msra.mxu1 %v5105_v36  ;;  %v1268_v36 = vadd.f32 %v5087_v58, %v5059_v6  ;;  %v1113_v44 = vadd.f32 %v5018_v0, %v1083_v28  ;;  %v1483_v0 = vadd.f32 %v5188_v23, %v1453_v13 }
 0x13e   : > { %3408 = vmatpush.msrb.mxu3 %v5107_v30  ;;  %3381 = vmatpush.msrb.mxu2 %v3284_v1  ;;  %v955_v33 = vadd.f32 %v4929_v50, %v928_v63 }
 0x13f   : > { %3322 = vmatpush.msrb.mxu0 %v5146_v11  ;;  %3231 = vmatmul.f32.vlgmr.msra.gmra.mxu1 %v4055_v20  ;;  %v1727_v56 = vpop.f32.mrf.mxu0  ;;  %v1140_v6 = vadd.f32 %v5036_v29, %v1113_v44  ;;  %v1298_v15 = vadd.f32 %v5099_v41, %v1268_v36 }
 0x140   : > { %3410 = vmatpush.msrb.mxu3 %v5118_v52  ;;  %3348 = vmatpush.msrb.mxu1 %v5107_v30  ;;  %v1668_v30 = vadd.f32 %v1667_v60, %v1638_v4  ;;  %v988_v45 = vadd.f32 %v4948_v57, %v955_v33 }
 0x141   : > { %3385 = vmatpush.msrb.mxu2 %v3290_v10  ;;  %3325 = vmatpush.msrb.mxu0 %v5162_v46  ;;  %v1325_v41 = vadd.f32 %v5101_v53, %v1298_v15 }
 0x142   : > { %3412 = vmatpush.msrb.mxu3 %v5134_v12  ;;  %3350 = vmatpush.msrb.mxu1 %v5118_v52  ;;  %v1173_v52 = vadd.f32 %v5048_v25, %v1140_v6  ;;  %v1695_v47 = vadd.f32 %v1694_v59, %v1668_v30 }
 0x143   : > { %3389 = vmatpush.msrb.mxu2 %v3296_v2  ;;  %3328 = vmatpush.msrb.mxu0 %v5177_v26 }
 0x144   : > { %3391 = vmatmul.f32.vlgmr.msrb.gmra.mxu2 %v4055_v20  ;;  %3331 = vmatmul.f32.vlgmr.msrb.gmra.mxu0 %v4070_v31  ;;  %v1510_v31 = vadd.f32 %v5202_v18, %v1483_v0  ;;  %v1198_v11 = vadd.f32 %v5050_v40, %v1173_v52 }
 0x145   : > { %3352 = vmatpush.msrb.mxu1 %v5134_v12  ;;  %v1752_v58 = vpop.f32.mrf.mxu1  ;;  %3414 = vmatpush.msrb.mxu3 %v5148_v34 }
 0x146   : > { %3416 = vmatmul.f32.vlgmr.msrb.gmra.mxu3 %v4055_v20  ;;  %v1781_v39 = vpop.f32.mrf.mxu2  ;;  %v1543_v50 = vadd.f32 %v5212_v35, %v1510_v31  ;;  %v1358_v20 = vadd.f32 %v5120_v5, %v1325_v41  ;;  %v3438_v53 = vrot.slane %v1198_v11, 5 }
 0x147   : > { %3354 = vmatpush.msrb.mxu1 %v5148_v34  ;;  %v1822_v29 = vpop.f32.mrf.mxu3  ;;  %v1728_v34 = vadd.f32 %v1727_v56, %v1695_v47 }
 0x148   : > { %3358 = vmatmul.f32.vlgmr.msrb.gmra.mxu1 %v4084_v38  ;;  %v1823_v14 = vadd.f32 %v1822_v29, %v1781_v39  ;;  %v1013_v38 = vadd.f32 %v4983_v42, %v988_v45  ;;  %v1568_v25 = vadd.f32 %v5214_v49, %v1543_v50  ;;  %v1383_v57 = vadd.f32 %v5155_v8, %v1358_v20 }
 0x149   : > { %v1852_v12 = vpop.f32.mrf.mxu0  ;;  %v1753_v1 = vadd.f32 %v1752_v58, %v1728_v34 }
 0x14a   : > { %v1853_v51 = vadd.f32 %v1852_v12, %v1823_v14  ;;  %v3437_v40 = vrot.slane %v1013_v38, 6  ;;  %v3440_v54 = vrot.slane %v1568_v25, 3  ;;  %v3439_v42 = vrot.slane %v1383_v57, 4 }
 0x14b   : > { %v3441_v23 = vrot.slane %v1753_v1, 2 }
 0x14c   : > { %v3453_v10 = vsel %vm3452_vm2, %v3437_v40, %v3438_v53  ;;  %v3457_v48 = vsel %vm3456_vm4, %v3439_v42, %v3440_v54 }
 0x14d   : > { %v3455_v2 = vsel %vm3454_vm3, %v4904_v7, %v3453_v10 }
 0x14f   : > { %v1879_v9 = vpop.f32.mrf.mxu1 }
 0x150   : > { %v1880_v46 = vadd.f32 %v1879_v9, %v1853_v51  ;;  %v1912_v55 = vpop.f32.mrf.mxu2 }
 0x151   : > { %v1937_v21 = vpop.f32.mrf.mxu3 }
 0x152   : > { %v1913_v26 = vadd.f32 %v1912_v55, %v1880_v46 }
 0x153   : > { %v1966_v61 = vpop.f32.mrf.mxu0 }
 0x154   : > { %v1938_v5 = vadd.f32 %v1937_v21, %v1913_v26 }
 0x156   : > { %v3442_v27 = vrot.slane %v1938_v5, 1 }
 0x158   : > { %v3459_v8 = vsel %vm3458_vm5, %v3441_v23, %v3442_v27 }
 0x159   : > { %v3461_v37 = vsel %vm3460_vm6, %v3457_v48, %v3459_v8  ;;  %v2007_v62 = vpop.f32.mrf.mxu1 }
 0x15a   : > { %v3463_v17 = vsel %vm3462_vm7, %v3455_v2, %v3461_v37  ;;  %v2008_v18 = vadd.f32 %v2007_v62, %v1966_v61  ;;  %v2037_v24 = vpop.f32.mrf.mxu2 }
 0x15b   : > { %v2064_v3 = vpop.f32.mrf.mxu3  ;;  %3473 = vst [vmem:[%s5286_s14] sm:$0xff] %v3463_v17 }
 0x15c   : > { %v2038_v35 = vadd.f32 %v2037_v24, %v2008_v18 }
 0x15d   : > { %v2097_v43 = vpop.f32.mrf.mxu0 }
 0x15e   : > { %v2065_v49 = vadd.f32 %v2064_v3, %v2038_v35 }
 0x160   : > { %v2098_v16 = vadd.f32 %v2097_v43, %v2065_v49 }
 0x163   : > { %v2122_v22 = vpop.f32.mrf.mxu1 }
 0x164   : > { %v2123_v32 = vadd.f32 %v2122_v22, %v2098_v16  ;;  %v2151_v60 = vpop.f32.mrf.mxu2 }
 0x165   : > { %v2192_v7 = vpop.f32.mrf.mxu3 }
 0x166   : > { %v2193_v59 = vadd.f32 %v2192_v7, %v2151_v60 }
 0x167   : > { %v2222_v19 = vpop.f32.mrf.mxu0 }
 0x168   : > { %v2223_v28 = vadd.f32 %v2222_v19, %v2193_v59 }
 0x16d   : > { %v2249_v56 = vpop.f32.mrf.mxu1 }
 0x16e   : > { %v2250_v36 = vadd.f32 %v2249_v56, %v2223_v28  ;;  %v2282_v13 = vpop.f32.mrf.mxu2 }
 0x16f   : > { %v2307_v4 = vpop.f32.mrf.mxu3 }
 0x170   : > { %v2283_v63 = vadd.f32 %v2282_v13, %v2250_v36 }
 0x171   : > { %v2336_v6 = vpop.f32.mrf.mxu0 }
 0x172   : > { %v2308_v44 = vadd.f32 %v2307_v4, %v2283_v63 }
 0x174   : > { %v3443_v58 = vrot.slane %v2308_v44, 7 }
 0x176   : > { %v5290_v15 = vsel %vm3450_vm1, %v2123_v32, %v3443_v58 }
 0x177   : > { %v2377_v0 = vpop.f32.mrf.mxu1 }
 0x178   : > { %v2407_v30 = vpop.f32.mrf.mxu2  ;;  %v2378_v40 = vadd.f32 %v2377_v0, %v2336_v6 }
 0x179   : > { %v2434_v33 = vpop.f32.mrf.mxu3 }
 0x17a   : > { %v2408_v23 = vadd.f32 %v2407_v30, %v2378_v40 }
 0x17b   : > { %v2467_v39 = vpop.f32.mrf.mxu0 }
 0x17c   : > { %v2435_v17 = vadd.f32 %v2434_v33, %v2408_v23 }
 0x17e   : > { %v2468_v32 = vadd.f32 %v2467_v39, %v2435_v17 }
 0x181   : > { %v2492_v29 = vpop.f32.mrf.mxu1 }
 0x182   : > { %v2521_v31 = vpop.f32.mrf.mxu2  ;;  %v2493_v13 = vadd.f32 %v2492_v29, %v2468_v32 }
 0x183   : > { %v2562_v52 = vpop.f32.mrf.mxu3 }
 0x184   : > { %v2563_v54 = vadd.f32 %v2562_v52, %v2521_v31  ;;  %v3444_v33 = vrot.slane %v2493_v13, 6 }
 0x185   : > { %v2592_v41 = vpop.f32.mrf.mxu0 }
 0x186   : > { %v2593_v27 = vadd.f32 %v2592_v41, %v2563_v54 }
 0x18b   : > { %v2619_v47 = vpop.f32.mrf.mxu1 }
 0x18c   : > { %v2652_v14 = vpop.f32.mrf.mxu2  ;;  %v2620_v48 = vadd.f32 %v2619_v47, %v2593_v27 }
 0x18d   : > { %v2677_v12 = vpop.f32.mrf.mxu3 }
 0x18e   : > { %v2653_v49 = vadd.f32 %v2652_v14, %v2620_v48 }
 0x18f   : > { %v2706_v45 = vpop.f32.mrf.mxu0 }
 0x190   : > { %v2678_v59 = vadd.f32 %v2677_v12, %v2653_v49 }
 0x192   : > { %v3445_v6 = vrot.slane %v2678_v59, 5 }
 0x194   : > { %v3465_v29 = vsel %vm3452_vm2, %v3444_v33, %v3445_v6 }
 0x195   : > { %v2747_v50 = vpop.f32.mrf.mxu1 }
 0x196   : > { %v2777_v11 = vpop.f32.mrf.mxu2  ;;  %v2748_v61 = vadd.f32 %v2747_v50, %v2706_v45  ;;  %v3466_v45 = vsel %vm3454_vm3, %v5290_v15, %v3465_v29 }
 0x197   : > { %v2804_v20 = vpop.f32.mrf.mxu3 }
 0x198   : > { %v2778_v8 = vadd.f32 %v2777_v11, %v2748_v61 }
 0x199   : > { %v2837_v34 = vpop.f32.mrf.mxu0 }
 0x19a   : > { %v2805_v43 = vadd.f32 %v2804_v20, %v2778_v8 }
 0x19c   : > { %v2838_v19 = vadd.f32 %v2837_v34, %v2805_v43 }
 0x19f   : > { %v2862_v51 = vpop.f32.mrf.mxu1 }
 0x1a0   : > { %v2891_v38 = vpop.f32.mrf.mxu2  ;;  %v2863_v58 = vadd.f32 %v2862_v51, %v2838_v19 }
 0x1a1   : > { %v2932_v9 = vpop.f32.mrf.mxu3 }
 0x1a2   : > { %v2933_v10 = vadd.f32 %v2932_v9, %v2891_v38  ;;  %v3446_v52 = vrot.slane %v2863_v58, 4 }
 0x1a3   : > { %v2962_v25 = vpop.f32.mrf.mxu0 }
 0x1a4   : > { %v2963_v2 = vadd.f32 %v2962_v25, %v2933_v10 }
 0x1a9   : > { %v2989_v46 = vpop.f32.mrf.mxu1 }
 0x1aa   : > { %v3022_v53 = vpop.f32.mrf.mxu2  ;;  %v2990_v18 = vadd.f32 %v2989_v46, %v2963_v2 }
 0x1ab   : > { %v3047_v55 = vpop.f32.mrf.mxu3 }
 0x1ac   : > { %v3023_v60 = vadd.f32 %v3022_v53, %v2990_v18 }
 0x1ad   : > { %v3076_v21 = vpop.f32.mrf.mxu0 }
 0x1ae   : > { %v3048_v4 = vadd.f32 %v3047_v55, %v3023_v60 }
 0x1b0   : > { %v3447_v39 = vrot.slane %v3048_v4, 3 }
 0x1b2   : > { %v3467_v14 = vsel %vm3456_vm4, %v3446_v52, %v3447_v39 }
 0x1b3   : > { %v3117_v57 = vpop.f32.mrf.mxu1 }
 0x1b4   : > { %v3147_v1 = vpop.f32.mrf.mxu2  ;;  %v3118_v42 = vadd.f32 %v3117_v57, %v3076_v21 }
 0x1b5   : > { %v3174_v26 = vpop.f32.mrf.mxu3 }
 0x1b6   : > { %v3148_v37 = vadd.f32 %v3147_v1, %v3118_v42 }
 0x1b7   : > { %v3207_v5 = vpop.f32.mrf.mxu0 }
 0x1b8   : > { %v3175_v16 = vadd.f32 %v3174_v26, %v3148_v37 }
 0x1ba   : > { %v3208_v28 = vadd.f32 %v3207_v5, %v3175_v16 }
 0x1bc   : > { %v3232_v62 = vpop.f32.mrf.mxu1 }
 0x1bd   : > { %v3233_v0 = vadd.f32 %v3232_v62, %v3208_v28 }
 0x1be   : > { %v3261_v24 = vpop.f32.mrf.mxu2 }
 0x1bf   : > { %v3302_v3 = vpop.f32.mrf.mxu3  ;;  %v3448_v41 = vrot.slane %v3233_v0, 2 }
 0x1c0   : > { %v3303_v35 = vadd.f32 %v3302_v3, %v3261_v24 }
 0x1c1   : > { %v3332_v22 = vpop.f32.mrf.mxu0 }
 0x1c2   : > { %v3333_v7 = vadd.f32 %v3332_v22, %v3303_v35 }
 0x1c5   : > { %v3359_v56 = vpop.f32.mrf.mxu1 }
 0x1c6   : > { %v3360_v36 = vadd.f32 %v3359_v56, %v3333_v7 }
 0x1c7   : > { %v3392_v63 = vpop.f32.mrf.mxu2 }
 0x1c8   : > { %v3393_v44 = vadd.f32 %v3392_v63, %v3360_v36 }
 0x1c9   : > { %v3417_v30 = vpop.f32.mrf.mxu3 }
 0x1ca   : > { %v3418_v31 = vadd.f32 %v3417_v30, %v3393_v44 }
 0x1cc   : > { %v3449_v47 = vrot.slane %v3418_v31, 1 }
 0x1ce   : > { %v3468_v12 = vsel %vm3458_vm5, %v3448_v41, %v3449_v47 }
 0x1cf   : > { %v3469_v50 = vsel %vm3460_vm6, %v3467_v14, %v3468_v12 }
 0x1d0   : > { %v3470_v11 = vsel %vm3462_vm7, %v3466_v45, %v3469_v50 }
 0x1d1   : > { %3474 = vst [vmem:[%s5286_s14 + $0x8] sm:$0xff] %v3470_v11 }
 0x1d2   : > { %3811 = shalt.err (!%p3808_p10)
}
 0x1d3   : > { %3623 = dma.vmem_to_hbm [thread:$0]  (%p3964_p5), %s3489_s0, 256, %s3491_s10, %s3476_s16  }
 0x1d4 PF: > { %p3643_p11 = scmp.ge.s32.totalorder %s3860_s22, 2  ;;  %s3502_s15 = sand.u32 1, %s3848_s19  }
 0x1d5   : > { %s3503_s3 = scalar_lea.sflag [#allocation6], %s3502_s15 }
 0x1d6   : > { %p3637_p12 = pnand %p3643_p11, %p3931_p6 }
 0x1d8   : > { %p3638_p13 = pneg %p3637_p12 }
 0x1da   : > { %3843 = dma.done.wait (%p3638_p13), %s3503_s3, 256  }
 0x1db   : > { %3845 = vsyncadd (%p3638_p13), %s3503_s3, 4294967040  ;;  %s5351_s29 = sld [smem:[#allocation16_spill]]  ;;  %p28_p0 = scmp.ge.s32.totalorder %s3948_s6, 12  }
 0x1dc   : > { %s5352_s19 = smov %s3852_s20  ;;  %s5353_s20 = smov %s3856_s21 }
 0x1dd   : > { %s5355_s22 = smov %s3948_s6  ;;  %30 = sbr.rel (!%p28_p0) target bundleno = 14 (0xe), region = 95 }
 0x1e1   : > { %s5354_s21 = smov %s5351_s29 }
 0x1e2   :  { %3509 = vsyncpa [#allocation5], 1 }
 0x1e3   :  { %3511 = vsyncpa [#allocation5 + $0x1], 1 }
 0x1e4   :  { %3512 = vsyncpa [#allocation8], 1 }
 0x1e5   :  { %3514 = vsyncpa [#allocation8 + $0x1], 1 }
 0x1e6   :  { %3515 = vsyncpa [#allocation6], 1 }
 0x1e7   :  { %3517 = vsyncpa [#allocation6 + $0x1], 1 }

</bundles_post_ra>
